<compile_context>
chip_gen: v7x
topology: tpu7x:2x2x1
jax: 0.10.0
libtpu: 0.0.40
codegen_flags: <defaults>
</compile_context>

<pallas_src>
import functools

import jax
import jax.numpy as jnp
from jax import lax
from jax.experimental import pallas as pl
from jax.experimental.pallas import tpu as pltpu

# ---- small bert-small-like config (scaled down) ----
VOCAB = 64
MAX_POS = 16
TYPE_VOCAB = 2
HIDDEN = 32
NUM_HEADS = 2
HEAD_DIM = HIDDEN // NUM_HEADS
INTERMEDIATE = 64
NUM_LAYERS = 2
LN_EPS = 1e-12
OUT_PAD = 128  # lane-dense output row; real logit lives in lane 0

# Packed per-layer vector rows: (L, 8, 3H)
LV_B_QKV, LV_B_O, LV_LN1_G, LV_LN1_B, LV_B1, LV_B2, LV_LN2_G, LV_LN2_B = range(8)
# Packed misc rows: (8, H)
MS_EMB_LN_G, MS_EMB_LN_B, MS_TYPE0, MS_POOL_B, MS_CLS_W, MS_CLS_B = range(6)


def _gelu(x):
    # TODO(synk): HF BERT default is the exact erf gelu (~1e-3 rel. difference); tanh
    # approximation keeps the transcendental on the EUP and lowers cleanly.
    c = jnp.float32(0.7978845608028654)  # sqrt(2/pi)
    return 0.5 * x * (1.0 + jnp.tanh(c * (x + 0.044715 * x * x * x)))


def _ln(x, g, b):
    mean = jnp.mean(x, axis=-1, keepdims=True)
    xc = x - mean
    var = jnp.mean(xc * xc, axis=-1, keepdims=True)
    return xc * lax.rsqrt(var + LN_EPS) * g + b


# ---------------- fused whole-model kernel: one invocation = whole batch ----------------
def _bert_kernel(scale, B, S,
                 ids_ref, mask_ref, word_ref, pos_ref,
                 wqkv_ref, wo_ref, w1_ref, w2_ref, lvec_ref,
                 pw_ref, misc_ref,
                 out_ref, x_ref, ctx_ref):
    # ---- in-kernel embedding gather: word[id] + pos[s] + type[0] (token_type_ids == 0) ----
    type_row = misc_ref[MS_TYPE0:MS_TYPE0 + 1, :]                     # (1, H)
    for b in range(B):
        for s in range(S):
            tok = ids_ref[b, s]                                       # SMEM scalar
            row = word_ref[pl.ds(tok, 1), :] + pos_ref[s:s + 1, :] + type_row
            x_ref[b * S + s:b * S + s + 1, :] = row

    # Embedding LayerNorm over the whole (B*S, H) slab.
    x = _ln(x_ref[...],
            misc_ref[MS_EMB_LN_G:MS_EMB_LN_G + 1, :],
            misc_ref[MS_EMB_LN_B:MS_EMB_LN_B + 1, :])

    # BERT extended attention mask, per sequence: (B, S) additive key bias.
    neg_bias = (1.0 - mask_ref[...]) * (-10000.0)

    for l in range(NUM_LAYERS):                                       # static, unrolled
        # Fused QKV for ALL tokens of ALL sequences in one (B*S,H)@(H,3H) MXU pass.
        qkv = (jnp.dot(x, wqkv_ref[l], preferred_element_type=jnp.float32)
               + lvec_ref[l, LV_B_QKV:LV_B_QKV + 1, :])               # (B*S, 3H)

        # Attention: tiny per-(sequence, head) loop; contexts written to VMEM scratch at
        # static offsets (no concatenate / cross-lane relayout).
        for b in range(B):
            rows = slice(b * S, (b + 1) * S)
            nb = neg_bias[b:b + 1, :]                                 # (1, S)
            for h in range(NUM_HEADS):
                c0 = h * HEAD_DIM
                q_h = qkv[rows, c0:c0 + HEAD_DIM]                     # (S, Dh)
                k_h = qkv[rows, HIDDEN + c0:HIDDEN + c0 + HEAD_DIM]
                v_h = qkv[rows, 2 * HIDDEN + c0:2 * HIDDEN + c0 + HEAD_DIM]
                scores = lax.dot_general(q_h, k_h, (((1,), (1,)), ((), ())),
                                         preferred_element_type=jnp.float32) * scale + nb
                scores = scores - jnp.max(scores, axis=-1, keepdims=True)
                p = jnp.exp(scores)
                p = p / jnp.sum(p, axis=-1, keepdims=True)            # exact divide
                ctx_ref[rows, c0:c0 + HEAD_DIM] = jnp.dot(
                    p, v_h, preferred_element_type=jnp.float32)

        # Attention output dense + residual + LN (batched over B*S tokens).
        attn = (jnp.dot(ctx_ref[...], wo_ref[l], preferred_element_type=jnp.float32)
                + lvec_ref[l, LV_B_O:LV_B_O + 1, 0:HIDDEN])
        x = _ln(attn + x,
                lvec_ref[l, LV_LN1_G:LV_LN1_G + 1, 0:HIDDEN],
                lvec_ref[l, LV_LN1_B:LV_LN1_B + 1, 0:HIDDEN])

        # FFN: dense + gelu, dense, residual + LN.
        h1 = _gelu(jnp.dot(x, w1_ref[l], preferred_element_type=jnp.float32)
                   + lvec_ref[l, LV_B1:LV_B1 + 1, 0:INTERMEDIATE])
        ffn = (jnp.dot(h1, w2_ref[l], preferred_element_type=jnp.float32)
               + lvec_ref[l, LV_B2:LV_B2 + 1, 0:HIDDEN])
        x = _ln(ffn + x,
                lvec_ref[l, LV_LN2_G:LV_LN2_G + 1, 0:HIDDEN],
                lvec_ref[l, LV_LN2_B:LV_LN2_B + 1, 0:HIDDEN])

    # BERT pooler on the [CLS] (first) token of every sequence, all batches at once.
    cls = jnp.concatenate([x[b * S:b * S + 1, :] for b in range(B)], axis=0)   # (B, H)
    pooled = jnp.tanh(jnp.dot(cls, pw_ref[...], preferred_element_type=jnp.float32)
                      + misc_ref[MS_POOL_B:MS_POOL_B + 1, :])

    # nn.Dropout(0.2) is identity at inference (and the reference feeds the pre-dropout
    # `logits` into self.linear anyway).  Classifier + sigmoid, fused.
    logit = (jnp.sum(pooled * misc_ref[MS_CLS_W:MS_CLS_W + 1, :], axis=-1, keepdims=True)
             + misc_ref[MS_CLS_B:MS_CLS_B + 1, 0:1])                  # (B, 1)
    pred = 1.0 / (1.0 + jnp.exp(-logit))

    # Lane-dense unmasked store; sliced back to (B, 1) outside.
    out_ref[...] = jnp.broadcast_to(pred, (B, OUT_PAD))


# ---------------- deterministic parameter init (already in packed/stacked layout) --------
def init_params(key):
    keys = jax.random.split(key, 6 + NUM_LAYERS)

    def nrm(k, shape):
        return jax.random.normal(k, shape, jnp.float32) * 0.02

    word_emb = nrm(keys[0], (VOCAB, HIDDEN))
    pos_emb = nrm(keys[1], (MAX_POS, HIDDEN))
    type_emb = nrm(keys[2], (TYPE_VOCAB, HIDDEN))
    pooler_w = nrm(keys[3], (HIDDEN, HIDDEN))
    cls_w = nrm(keys[4], (HIDDEN,))

    w_qkv, w_o, w1, w2 = [], [], [], []
    for l in range(NUM_LAYERS):
        lk = jax.random.split(keys[6 + l], 6)
        wq = nrm(lk[0], (HIDDEN, HIDDEN))
        wk = nrm(lk[1], (HIDDEN, HIDDEN))
        wv = nrm(lk[2], (HIDDEN, HIDDEN))
        w_qkv.append(jnp.concatenate([wq, wk, wv], axis=1))           # (H, 3H)
        w_o.append(nrm(lk[3], (HIDDEN, HIDDEN)))
        w1.append(nrm(lk[4], (HIDDEN, INTERMEDIATE)))
        w2.append(nrm(lk[5], (INTERMEDIATE, HIDDEN)))

    # Packed per-layer bias / LayerNorm vectors: (L, 8, 3H), one vector per sublane row.
    def row(vec):
        vec = jnp.asarray(vec, jnp.float32).reshape(1, -1)
        return jnp.pad(vec, ((0, 0), (0, 3 * HIDDEN - vec.shape[-1])))

    one_layer = jnp.concatenate([
        row(jnp.zeros(3 * HIDDEN)),       # b_qkv
        row(jnp.zeros(HIDDEN)),           # b_o
        row(jnp.ones(HIDDEN)),            # ln1_gamma
        row(jnp.zeros(HIDDEN)),           # ln1_beta
        row(jnp.zeros(INTERMEDIATE)),     # b1
        row(jnp.zeros(HIDDEN)),           # b2
        row(jnp.ones(HIDDEN)),            # ln2_gamma
        row(jnp.zeros(HIDDEN)),           # ln2_beta
    ], axis=0)
    layer_vecs = jnp.stack([one_layer] * NUM_LAYERS)                  # (L, 8, 3H)

    # Packed misc vectors: (8, H).  token_type_ids default to 0 in the reference forward,
    # so only type_emb[0] is needed by the kernel.
    misc = jnp.zeros((8, HIDDEN), jnp.float32)
    misc = misc.at[MS_EMB_LN_G].set(1.0)                              # emb LN gamma
    misc = misc.at[MS_TYPE0].set(type_emb[0])                         # type embedding row 0
    misc = misc.at[MS_CLS_W].set(cls_w)                               # Linear(H,1) weight row
    # MS_EMB_LN_B / MS_POOL_B / MS_CLS_B rows stay zero (standard bias init).

    return {
        "word_emb": word_emb,
        "pos_emb": pos_emb,
        "w_qkv": jnp.stack(w_qkv),        # (L, H, 3H)
        "w_o": jnp.stack(w_o),            # (L, H, H)
        "w1": jnp.stack(w1),              # (L, H, I)
        "w2": jnp.stack(w2),              # (L, I, H)
        "layer_vecs": layer_vecs,         # (L, 8, 3H)
        "pooler_w": pooler_w,             # (H, H)
        "misc": misc,                     # (8, H)
    }


# ---------------- LegalBertBinaryCls.forward ----------------
def legal_bert_binary_cls_forward(params, input_ids, attention_mask):
    B, S = input_ids.shape
    assert S <= MAX_POS
    mask_f = attention_mask.astype(jnp.float32)                       # (B, S)

    vmem = pl.BlockSpec(memory_space=pltpu.MemorySpace.VMEM)
    smem = pl.BlockSpec(memory_space=pltpu.MemorySpace.SMEM)

    kernel = functools.partial(_bert_kernel, 1.0 / (HEAD_DIM ** 0.5), B, S)

    out = pl.pallas_call(
        kernel,
        out_shape=jax.ShapeDtypeStruct((B, OUT_PAD), jnp.float32),
        in_specs=[
            smem,   # input_ids        (B, S) int32
            vmem,   # attention_mask   (B, S) f32
            vmem,   # word_emb         (VOCAB, H)
            vmem,   # pos_emb          (MAX_POS, H)
            vmem,   # w_qkv            (L, H, 3H)
            vmem,   # w_o              (L, H, H)
            vmem,   # w1               (L, H, I)
            vmem,   # w2               (L, I, H)
            vmem,   # layer_vecs       (L, 8, 3H)
            vmem,   # pooler_w         (H, H)
            vmem,   # misc             (8, H)
        ],
        out_specs=vmem,
        scratch_shapes=[
            pltpu.VMEM((B * S, HIDDEN), jnp.float32),   # embedding / residual slab
            pltpu.VMEM((B * S, HIDDEN), jnp.float32),   # per-layer attention context
        ],
    )(input_ids.astype(jnp.int32), mask_f,
      params["word_emb"], params["pos_emb"],
      params["w_qkv"], params["w_o"], params["w1"], params["w2"],
      params["layer_vecs"], params["pooler_w"], params["misc"])

    return out[:, :1]                                                  # (B, 1)


if __name__ == "__main__":
    key = jax.random.PRNGKey(0)
    pkey, ikey = jax.random.split(key)
    params = init_params(pkey)

    B, S = 2, 8
    input_ids = jax.random.randint(ikey, (B, S), 0, VOCAB, dtype=jnp.int32)
    attention_mask = jnp.array([[1, 1, 1, 1, 1, 1, 1, 1],
                                [1, 1, 1, 1, 1, 0, 0, 0]], dtype=jnp.int32)

    fwd = jax.jit(legal_bert_binary_cls_forward)
    preds = fwd(params, input_ids, attention_mask)
    preds = jax.block_until_ready(preds)
    assert preds.shape == (B, 1)
    assert bool(jnp.all((preds >= 0.0) & (preds <= 1.0)))
    assert bool(jnp.all(jnp.isfinite(preds)))
    print("KERNEL_OK")
</pallas_src>

<mosaic_0001>
module attributes {stable_mosaic.version = 11 : i64} {
  func.func @_bert_kernel(%arg0: memref<2x8xi32, #tpu.memory_space<smem>>, %arg1: memref<2x8xf32, #tpu.memory_space<vmem>>, %arg2: memref<64x32xf32, #tpu.memory_space<vmem>>, %arg3: memref<16x32xf32, #tpu.memory_space<vmem>>, %arg4: memref<2x32x96xf32, #tpu.memory_space<vmem>>, %arg5: memref<2x32x32xf32, #tpu.memory_space<vmem>>, %arg6: memref<2x32x64xf32, #tpu.memory_space<vmem>>, %arg7: memref<2x64x32xf32, #tpu.memory_space<vmem>>, %arg8: memref<2x8x96xf32, #tpu.memory_space<vmem>>, %arg9: memref<32x32xf32, #tpu.memory_space<vmem>>, %arg10: memref<8x32xf32, #tpu.memory_space<vmem>>, %arg11: memref<2x128xf32, #tpu.memory_space<vmem>>, %arg12: memref<16x32xf32, #tpu.memory_space<vmem>>, %arg13: memref<16x32xf32, #tpu.memory_space<vmem>>) attributes {dimension_semantics = [], scalar_prefetch = 0 : i64, scratch_operands = 2 : i64, tpu.core_type = #tpu.core_type<tc>} {
    %c2 = arith.constant 2 : index
    %c0 = arith.constant 0 : index
    %0 = vector.load %arg10[%c2, %c0] : memref<8x32xf32, #tpu.memory_space<vmem>>, vector<1x32xf32>
    %c0_0 = arith.constant 0 : index
    %c0_1 = arith.constant 0 : index
    %1 = memref.load %arg0[%c0_0, %c0_1] : memref<2x8xi32, #tpu.memory_space<smem>>
    %2 = arith.index_cast %1 : i32 to index
    %c0_2 = arith.constant 0 : index
    %3 = vector.load %arg2[%2, %c0_2] : memref<64x32xf32, #tpu.memory_space<vmem>>, vector<1x32xf32>
    %c0_3 = arith.constant 0 : index
    %c0_4 = arith.constant 0 : index
    %4 = vector.load %arg3[%c0_3, %c0_4] : memref<16x32xf32, #tpu.memory_space<vmem>>, vector<1x32xf32>
    %5 = arith.addf %3, %4 : vector<1x32xf32>
    %6 = arith.addf %5, %0 : vector<1x32xf32>
    %c0_5 = arith.constant 0 : index
    %c0_6 = arith.constant 0 : index
    %7 = vector.load %arg12[%c0_5, %c0_6] : memref<16x32xf32, #tpu.memory_space<vmem>>, vector<1x32xf32>
    tpu.vector_store %arg12[%c0_5, %c0_6], %6 {strides = array<i32>} : memref<16x32xf32, #tpu.memory_space<vmem>>, vector<1x32xf32>,
    %c0_7 = arith.constant 0 : index
    %c1 = arith.constant 1 : index
    %8 = memref.load %arg0[%c0_7, %c1] : memref<2x8xi32, #tpu.memory_space<smem>>
    %9 = arith.index_cast %8 : i32 to index
    %c0_8 = arith.constant 0 : index
    %10 = vector.load %arg2[%9, %c0_8] : memref<64x32xf32, #tpu.memory_space<vmem>>, vector<1x32xf32>
    %c1_9 = arith.constant 1 : index
    %c0_10 = arith.constant 0 : index
    %11 = vector.load %arg3[%c1_9, %c0_10] : memref<16x32xf32, #tpu.memory_space<vmem>>, vector<1x32xf32>
    %12 = arith.addf %10, %11 : vector<1x32xf32>
    %13 = arith.addf %12, %0 : vector<1x32xf32>
    %c1_11 = arith.constant 1 : index
    %c0_12 = arith.constant 0 : index
    %14 = vector.load %arg12[%c1_11, %c0_12] : memref<16x32xf32, #tpu.memory_space<vmem>>, vector<1x32xf32>
    tpu.vector_store %arg12[%c1_11, %c0_12], %13 {strides = array<i32>} : memref<16x32xf32, #tpu.memory_space<vmem>>, vector<1x32xf32>,
    %c0_13 = arith.constant 0 : index
    %c2_14 = arith.constant 2 : index
    %15 = memref.load %arg0[%c0_13, %c2_14] : memref<2x8xi32, #tpu.memory_space<smem>>
    %16 = arith.index_cast %15 : i32 to index
    %c0_15 = arith.constant 0 : index
    %17 = vector.load %arg2[%16, %c0_15] : memref<64x32xf32, #tpu.memory_space<vmem>>, vector<1x32xf32>
    %c2_16 = arith.constant 2 : index
    %c0_17 = arith.constant 0 : index
    %18 = vector.load %arg3[%c2_16, %c0_17] : memref<16x32xf32, #tpu.memory_space<vmem>>, vector<1x32xf32>
    %19 = arith.addf %17, %18 : vector<1x32xf32>
    %20 = arith.addf %19, %0 : vector<1x32xf32>
    %c2_18 = arith.constant 2 : index
    %c0_19 = arith.constant 0 : index
    %21 = vector.load %arg12[%c2_18, %c0_19] : memref<16x32xf32, #tpu.memory_space<vmem>>, vector<1x32xf32>
    tpu.vector_store %arg12[%c2_18, %c0_19], %20 {strides = array<i32>} : memref<16x32xf32, #tpu.memory_space<vmem>>, vector<1x32xf32>,
    %c0_20 = arith.constant 0 : index
    %c3 = arith.constant 3 : index
    %22 = memref.load %arg0[%c0_20, %c3] : memref<2x8xi32, #tpu.memory_space<smem>>
    %23 = arith.index_cast %22 : i32 to index
    %c0_21 = arith.constant 0 : index
    %24 = vector.load %arg2[%23, %c0_21] : memref<64x32xf32, #tpu.memory_space<vmem>>, vector<1x32xf32>
    %c3_22 = arith.constant 3 : index
    %c0_23 = arith.constant 0 : index
    %25 = vector.load %arg3[%c3_22, %c0_23] : memref<16x32xf32, #tpu.memory_space<vmem>>, vector<1x32xf32>
    %26 = arith.addf %24, %25 : vector<1x32xf32>
    %27 = arith.addf %26, %0 : vector<1x32xf32>
    %c3_24 = arith.constant 3 : index
    %c0_25 = arith.constant 0 : index
    %28 = vector.load %arg12[%c3_24, %c0_25] : memref<16x32xf32, #tpu.memory_space<vmem>>, vector<1x32xf32>
    tpu.vector_store %arg12[%c3_24, %c0_25], %27 {strides = array<i32>} : memref<16x32xf32, #tpu.memory_space<vmem>>, vector<1x32xf32>,
    %c0_26 = arith.constant 0 : index
    %c4 = arith.constant 4 : index
    %29 = memref.load %arg0[%c0_26, %c4] : memref<2x8xi32, #tpu.memory_space<smem>>
    %30 = arith.index_cast %29 : i32 to index
    %c0_27 = arith.constant 0 : index
    %31 = vector.load %arg2[%30, %c0_27] : memref<64x32xf32, #tpu.memory_space<vmem>>, vector<1x32xf32>
    %c4_28 = arith.constant 4 : index
    %c0_29 = arith.constant 0 : index
    %32 = vector.load %arg3[%c4_28, %c0_29] : memref<16x32xf32, #tpu.memory_space<vmem>>, vector<1x32xf32>
    %33 = arith.addf %31, %32 : vector<1x32xf32>
    %34 = arith.addf %33, %0 : vector<1x32xf32>
    %c4_30 = arith.constant 4 : index
    %c0_31 = arith.constant 0 : index
    %35 = vector.load %arg12[%c4_30, %c0_31] : memref<16x32xf32, #tpu.memory_space<vmem>>, vector<1x32xf32>
    tpu.vector_store %arg12[%c4_30, %c0_31], %34 {strides = array<i32>} : memref<16x32xf32, #tpu.memory_space<vmem>>, vector<1x32xf32>,
    %c0_32 = arith.constant 0 : index
    %c5 = arith.constant 5 : index
    %36 = memref.load %arg0[%c0_32, %c5] : memref<2x8xi32, #tpu.memory_space<smem>>
    %37 = arith.index_cast %36 : i32 to index
    %c0_33 = arith.constant 0 : index
    %38 = vector.load %arg2[%37, %c0_33] : memref<64x32xf32, #tpu.memory_space<vmem>>, vector<1x32xf32>
    %c5_34 = arith.constant 5 : index
    %c0_35 = arith.constant 0 : index
    %39 = vector.load %arg3[%c5_34, %c0_35] : memref<16x32xf32, #tpu.memory_space<vmem>>, vector<1x32xf32>
    %40 = arith.addf %38, %39 : vector<1x32xf32>
    %41 = arith.addf %40, %0 : vector<1x32xf32>
    %c5_36 = arith.constant 5 : index
    %c0_37 = arith.constant 0 : index
    %42 = vector.load %arg12[%c5_36, %c0_37] : memref<16x32xf32, #tpu.memory_space<vmem>>, vector<1x32xf32>
    tpu.vector_store %arg12[%c5_36, %c0_37], %41 {strides = array<i32>} : memref<16x32xf32, #tpu.memory_space<vmem>>, vector<1x32xf32>,
    %c0_38 = arith.constant 0 : index
    %c6 = arith.constant 6 : index
    %43 = memref.load %arg0[%c0_38, %c6] : memref<2x8xi32, #tpu.memory_space<smem>>
    %44 = arith.index_cast %43 : i32 to index
    %c0_39 = arith.constant 0 : index
    %45 = vector.load %arg2[%44, %c0_39] : memref<64x32xf32, #tpu.memory_space<vmem>>, vector<1x32xf32>
    %c6_40 = arith.constant 6 : index
    %c0_41 = arith.constant 0 : index
    %46 = vector.load %arg3[%c6_40, %c0_41] : memref<16x32xf32, #tpu.memory_space<vmem>>, vector<1x32xf32>
    %47 = arith.addf %45, %46 : vector<1x32xf32>
    %48 = arith.addf %47, %0 : vector<1x32xf32>
    %c6_42 = arith.constant 6 : index
    %c0_43 = arith.constant 0 : index
    %49 = vector.load %arg12[%c6_42, %c0_43] : memref<16x32xf32, #tpu.memory_space<vmem>>, vector<1x32xf32>
    tpu.vector_store %arg12[%c6_42, %c0_43], %48 {strides = array<i32>} : memref<16x32xf32, #tpu.memory_space<vmem>>, vector<1x32xf32>,
    %c0_44 = arith.constant 0 : index
    %c7 = arith.constant 7 : index
    %50 = memref.load %arg0[%c0_44, %c7] : memref<2x8xi32, #tpu.memory_space<smem>>
    %51 = arith.index_cast %50 : i32 to index
    %c0_45 = arith.constant 0 : index
    %52 = vector.load %arg2[%51, %c0_45] : memref<64x32xf32, #tpu.memory_space<vmem>>, vector<1x32xf32>
    %c7_46 = arith.constant 7 : index
    %c0_47 = arith.constant 0 : index
    %53 = vector.load %arg3[%c7_46, %c0_47] : memref<16x32xf32, #tpu.memory_space<vmem>>, vector<1x32xf32>
    %54 = arith.addf %52, %53 : vector<1x32xf32>
    %55 = arith.addf %54, %0 : vector<1x32xf32>
    %c7_48 = arith.constant 7 : index
    %c0_49 = arith.constant 0 : index
    %56 = vector.load %arg12[%c7_48, %c0_49] : memref<16x32xf32, #tpu.memory_space<vmem>>, vector<1x32xf32>
    tpu.vector_store %arg12[%c7_48, %c0_49], %55 {strides = array<i32>} : memref<16x32xf32, #tpu.memory_space<vmem>>, vector<1x32xf32>,
    %c1_50 = arith.constant 1 : index
    %c0_51 = arith.constant 0 : index
    %57 = memref.load %arg0[%c1_50, %c0_51] : memref<2x8xi32, #tpu.memory_space<smem>>
    %58 = arith.index_cast %57 : i32 to index
    %c0_52 = arith.constant 0 : index
    %59 = vector.load %arg2[%58, %c0_52] : memref<64x32xf32, #tpu.memory_space<vmem>>, vector<1x32xf32>
    %c0_53 = arith.constant 0 : index
    %c0_54 = arith.constant 0 : index
    %60 = vector.load %arg3[%c0_53, %c0_54] : memref<16x32xf32, #tpu.memory_space<vmem>>, vector<1x32xf32>
    %61 = arith.addf %59, %60 : vector<1x32xf32>
    %62 = arith.addf %61, %0 : vector<1x32xf32>
    %c8 = arith.constant 8 : index
    %c0_55 = arith.constant 0 : index
    %63 = vector.load %arg12[%c8, %c0_55] : memref<16x32xf32, #tpu.memory_space<vmem>>, vector<1x32xf32>
    tpu.vector_store %arg12[%c8, %c0_55], %62 {strides = array<i32>} : memref<16x32xf32, #tpu.memory_space<vmem>>, vector<1x32xf32>,
    %c1_56 = arith.constant 1 : index
    %c1_57 = arith.constant 1 : index
    %64 = memref.load %arg0[%c1_56, %c1_57] : memref<2x8xi32, #tpu.memory_space<smem>>
    %65 = arith.index_cast %64 : i32 to index
    %c0_58 = arith.constant 0 : index
    %66 = vector.load %arg2[%65, %c0_58] : memref<64x32xf32, #tpu.memory_space<vmem>>, vector<1x32xf32>
    %c1_59 = arith.constant 1 : index
    %c0_60 = arith.constant 0 : index
    %67 = vector.load %arg3[%c1_59, %c0_60] : memref<16x32xf32, #tpu.memory_space<vmem>>, vector<1x32xf32>
    %68 = arith.addf %66, %67 : vector<1x32xf32>
    %69 = arith.addf %68, %0 : vector<1x32xf32>
    %c9 = arith.constant 9 : index
    %c0_61 = arith.constant 0 : index
    %70 = vector.load %arg12[%c9, %c0_61] : memref<16x32xf32, #tpu.memory_space<vmem>>, vector<1x32xf32>
    tpu.vector_store %arg12[%c9, %c0_61], %69 {strides = array<i32>} : memref<16x32xf32, #tpu.memory_space<vmem>>, vector<1x32xf32>,
    %c1_62 = arith.constant 1 : index
    %c2_63 = arith.constant 2 : index
    %71 = memref.load %arg0[%c1_62, %c2_63] : memref<2x8xi32, #tpu.memory_space<smem>>
    %72 = arith.index_cast %71 : i32 to index
    %c0_64 = arith.constant 0 : index
    %73 = vector.load %arg2[%72, %c0_64] : memref<64x32xf32, #tpu.memory_space<vmem>>, vector<1x32xf32>
    %c2_65 = arith.constant 2 : index
    %c0_66 = arith.constant 0 : index
    %74 = vector.load %arg3[%c2_65, %c0_66] : memref<16x32xf32, #tpu.memory_space<vmem>>, vector<1x32xf32>
    %75 = arith.addf %73, %74 : vector<1x32xf32>
    %76 = arith.addf %75, %0 : vector<1x32xf32>
    %c10 = arith.constant 10 : index
    %c0_67 = arith.constant 0 : index
    %77 = vector.load %arg12[%c10, %c0_67] : memref<16x32xf32, #tpu.memory_space<vmem>>, vector<1x32xf32>
    tpu.vector_store %arg12[%c10, %c0_67], %76 {strides = array<i32>} : memref<16x32xf32, #tpu.memory_space<vmem>>, vector<1x32xf32>,
    %c1_68 = arith.constant 1 : index
    %c3_69 = arith.constant 3 : index
    %78 = memref.load %arg0[%c1_68, %c3_69] : memref<2x8xi32, #tpu.memory_space<smem>>
    %79 = arith.index_cast %78 : i32 to index
    %c0_70 = arith.constant 0 : index
    %80 = vector.load %arg2[%79, %c0_70] : memref<64x32xf32, #tpu.memory_space<vmem>>, vector<1x32xf32>
    %c3_71 = arith.constant 3 : index
    %c0_72 = arith.constant 0 : index
    %81 = vector.load %arg3[%c3_71, %c0_72] : memref<16x32xf32, #tpu.memory_space<vmem>>, vector<1x32xf32>
    %82 = arith.addf %80, %81 : vector<1x32xf32>
    %83 = arith.addf %82, %0 : vector<1x32xf32>
    %c11 = arith.constant 11 : index
    %c0_73 = arith.constant 0 : index
    %84 = vector.load %arg12[%c11, %c0_73] : memref<16x32xf32, #tpu.memory_space<vmem>>, vector<1x32xf32>
    tpu.vector_store %arg12[%c11, %c0_73], %83 {strides = array<i32>} : memref<16x32xf32, #tpu.memory_space<vmem>>, vector<1x32xf32>,
    %c1_74 = arith.constant 1 : index
    %c4_75 = arith.constant 4 : index
    %85 = memref.load %arg0[%c1_74, %c4_75] : memref<2x8xi32, #tpu.memory_space<smem>>
    %86 = arith.index_cast %85 : i32 to index
    %c0_76 = arith.constant 0 : index
    %87 = vector.load %arg2[%86, %c0_76] : memref<64x32xf32, #tpu.memory_space<vmem>>, vector<1x32xf32>
    %c4_77 = arith.constant 4 : index
    %c0_78 = arith.constant 0 : index
    %88 = vector.load %arg3[%c4_77, %c0_78] : memref<16x32xf32, #tpu.memory_space<vmem>>, vector<1x32xf32>
    %89 = arith.addf %87, %88 : vector<1x32xf32>
    %90 = arith.addf %89, %0 : vector<1x32xf32>
    %c12 = arith.constant 12 : index
    %c0_79 = arith.constant 0 : index
    %91 = vector.load %arg12[%c12, %c0_79] : memref<16x32xf32, #tpu.memory_space<vmem>>, vector<1x32xf32>
    tpu.vector_store %arg12[%c12, %c0_79], %90 {strides = array<i32>} : memref<16x32xf32, #tpu.memory_space<vmem>>, vector<1x32xf32>,
    %c1_80 = arith.constant 1 : index
    %c5_81 = arith.constant 5 : index
    %92 = memref.load %arg0[%c1_80, %c5_81] : memref<2x8xi32, #tpu.memory_space<smem>>
    %93 = arith.index_cast %92 : i32 to index
    %c0_82 = arith.constant 0 : index
    %94 = vector.load %arg2[%93, %c0_82] : memref<64x32xf32, #tpu.memory_space<vmem>>, vector<1x32xf32>
    %c5_83 = arith.constant 5 : index
    %c0_84 = arith.constant 0 : index
    %95 = vector.load %arg3[%c5_83, %c0_84] : memref<16x32xf32, #tpu.memory_space<vmem>>, vector<1x32xf32>
    %96 = arith.addf %94, %95 : vector<1x32xf32>
    %97 = arith.addf %96, %0 : vector<1x32xf32>
    %c13 = arith.constant 13 : index
    %c0_85 = arith.constant 0 : index
    %98 = vector.load %arg12[%c13, %c0_85] : memref<16x32xf32, #tpu.memory_space<vmem>>, vector<1x32xf32>
    tpu.vector_store %arg12[%c13, %c0_85], %97 {strides = array<i32>} : memref<16x32xf32, #tpu.memory_space<vmem>>, vector<1x32xf32>,
    %c1_86 = arith.constant 1 : index
    %c6_87 = arith.constant 6 : index
    %99 = memref.load %arg0[%c1_86, %c6_87] : memref<2x8xi32, #tpu.memory_space<smem>>
    %100 = arith.index_cast %99 : i32 to index
    %c0_88 = arith.constant 0 : index
    %101 = vector.load %arg2[%100, %c0_88] : memref<64x32xf32, #tpu.memory_space<vmem>>, vector<1x32xf32>
    %c6_89 = arith.constant 6 : index
    %c0_90 = arith.constant 0 : index
    %102 = vector.load %arg3[%c6_89, %c0_90] : memref<16x32xf32, #tpu.memory_space<vmem>>, vector<1x32xf32>
    %103 = arith.addf %101, %102 : vector<1x32xf32>
    %104 = arith.addf %103, %0 : vector<1x32xf32>
    %c14 = arith.constant 14 : index
    %c0_91 = arith.constant 0 : index
    %105 = vector.load %arg12[%c14, %c0_91] : memref<16x32xf32, #tpu.memory_space<vmem>>, vector<1x32xf32>
    tpu.vector_store %arg12[%c14, %c0_91], %104 {strides = array<i32>} : memref<16x32xf32, #tpu.memory_space<vmem>>, vector<1x32xf32>,
    %c1_92 = arith.constant 1 : index
    %c7_93 = arith.constant 7 : index
    %106 = memref.load %arg0[%c1_92, %c7_93] : memref<2x8xi32, #tpu.memory_space<smem>>
    %107 = arith.index_cast %106 : i32 to index
    %c0_94 = arith.constant 0 : index
    %108 = vector.load %arg2[%107, %c0_94] : memref<64x32xf32, #tpu.memory_space<vmem>>, vector<1x32xf32>
    %c7_95 = arith.constant 7 : index
    %c0_96 = arith.constant 0 : index
    %109 = vector.load %arg3[%c7_95, %c0_96] : memref<16x32xf32, #tpu.memory_space<vmem>>, vector<1x32xf32>
    %110 = arith.addf %108, %109 : vector<1x32xf32>
    %111 = arith.addf %110, %0 : vector<1x32xf32>
    %c15 = arith.constant 15 : index
    %c0_97 = arith.constant 0 : index
    %112 = vector.load %arg12[%c15, %c0_97] : memref<16x32xf32, #tpu.memory_space<vmem>>, vector<1x32xf32>
    tpu.vector_store %arg12[%c15, %c0_97], %111 {strides = array<i32>} : memref<16x32xf32, #tpu.memory_space<vmem>>, vector<1x32xf32>,
    %c0_98 = arith.constant 0 : index
    %c0_99 = arith.constant 0 : index
    %113 = vector.load %arg12[%c0_98, %c0_99] : memref<16x32xf32, #tpu.memory_space<vmem>>, vector<16x32xf32>
    %c0_100 = arith.constant 0 : index
    %c0_101 = arith.constant 0 : index
    %114 = vector.load %arg10[%c0_100, %c0_101] : memref<8x32xf32, #tpu.memory_space<vmem>>, vector<1x32xf32>
    %c1_102 = arith.constant 1 : index
    %c0_103 = arith.constant 0 : index
    %115 = vector.load %arg10[%c1_102, %c0_103] : memref<8x32xf32, #tpu.memory_space<vmem>>, vector<1x32xf32>
    %cst = arith.constant dense<0.000000e+00> : vector<16xf32>
    %116 = vector.multi_reduction <add>, %113, %cst [1] : vector<16x32xf32> to vector<16xf32>
    %117 = vector.shape_cast %116 : vector<16xf32> to vector<16x1xf32>
    %cst_104 = arith.constant 3.200000e+01 : f32
    %118 = vector.broadcast %cst_104 : f32 to vector<16x1xf32>
    %119 = arith.divf %117, %118 : vector<16x1xf32>
    %120 = vector.broadcast %119 : vector<16x1xf32> to vector<16x32xf32>
    %121 = arith.subf %113, %120 : vector<16x32xf32>
    %122 = arith.mulf %121, %121 : vector<16x32xf32>
    %cst_105 = arith.constant dense<0.000000e+00> : vector<16xf32>
    %123 = vector.multi_reduction <add>, %122, %cst_105 [1] : vector<16x32xf32> to vector<16xf32>
    %124 = vector.shape_cast %123 : vector<16xf32> to vector<16x1xf32>
    %cst_106 = arith.constant 3.200000e+01 : f32
    %125 = vector.broadcast %cst_106 : f32 to vector<16x1xf32>
    %126 = arith.divf %124, %125 : vector<16x1xf32>
    %cst_107 = arith.constant 9.99999996E-13 : f32
    %127 = vector.broadcast %cst_107 : f32 to vector<16x1xf32>
    %128 = arith.addf %126, %127 : vector<16x1xf32>
    %129 = math.rsqrt %128 : vector<16x1xf32>
    %130 = vector.broadcast %129 : vector<16x1xf32> to vector<16x32xf32>
    %131 = arith.mulf %121, %130 : vector<16x32xf32>
    %132 = vector.broadcast %114 : vector<1x32xf32> to vector<16x32xf32>
    %133 = arith.mulf %131, %132 : vector<16x32xf32>
    %134 = vector.broadcast %115 : vector<1x32xf32> to vector<16x32xf32>
    %135 = arith.addf %133, %134 : vector<16x32xf32>
    %c0_108 = arith.constant 0 : index
    %c0_109 = arith.constant 0 : index
    %136 = vector.load %arg1[%c0_108, %c0_109] : memref<2x8xf32, #tpu.memory_space<vmem>>, vector<2x8xf32>
    %cst_110 = arith.constant 1.000000e+00 : f32
    %137 = vector.broadcast %cst_110 : f32 to vector<2x8xf32>
    %138 = arith.subf %137, %136 : vector<2x8xf32>
    %cst_111 = arith.constant -1.000000e+04 : f32
    %139 = vector.broadcast %cst_111 : f32 to vector<2x8xf32>
    %140 = arith.mulf %138, %139 : vector<2x8xf32>
    %c0_112 = arith.constant 0 : index
    %c0_113 = arith.constant 0 : index
    %c0_114 = arith.constant 0 : index
    %141 = vector.load %arg4[%c0_112, %c0_113, %c0_114] : memref<2x32x96xf32, #tpu.memory_space<vmem>>, vector<1x32x96xf32>
    %142 = vector.shape_cast %141 : vector<1x32x96xf32> to vector<32x96xf32>
    %cst_115 = arith.constant dense<0.000000e+00> : vector<16x96xf32>
    %143 = tpu.matmul %135, %142, %cst_115 {dimension_numbers = #tpu.dot_dimension_numbers<[1], [0], [0], [1], [0, 0, 1, 1], [], []>} : vector<16x32xf32>, vector<32x96xf32>, vector<16x96xf32> -> vector<16x96xf32>
    %c0_116 = arith.constant 0 : index
    %c0_117 = arith.constant 0 : index
    %c0_118 = arith.constant 0 : index
    %144 = vector.load %arg8[%c0_116, %c0_117, %c0_118] : memref<2x8x96xf32, #tpu.memory_space<vmem>>, vector<1x1x96xf32>
    %145 = vector.shape_cast %144 : vector<1x1x96xf32> to vector<1x96xf32>
    %146 = vector.broadcast %145 : vector<1x96xf32> to vector<16x96xf32>
    %147 = arith.addf %143, %146 : vector<16x96xf32>
    %148 = vector.extract_strided_slice %140 {offsets = [0, 0], sizes = [1, 8], strides = [1, 1]} : vector<2x8xf32> to vector<1x8xf32>
    %149 = vector.extract_strided_slice %147 {offsets = [0, 0], sizes = [8, 16], strides = [1, 1]} : vector<16x96xf32> to vector<8x16xf32>
    %150 = vector.extract_strided_slice %147 {offsets = [0, 32], sizes = [8, 16], strides = [1, 1]} : vector<16x96xf32> to vector<8x16xf32>
    %151 = vector.extract_strided_slice %147 {offsets = [0, 64], sizes = [8, 16], strides = [1, 1]} : vector<16x96xf32> to vector<8x16xf32>
    %cst_119 = arith.constant dense<0.000000e+00> : vector<8x8xf32>
    %152 = tpu.matmul %149, %150, %cst_119 {dimension_numbers = #tpu.dot_dimension_numbers<[1], [1], [0], [0], [0, 0, 1, 0], [], []>} : vector<8x16xf32>, vector<8x16xf32>, vector<8x8xf32> -> vector<8x8xf32>
    %cst_120 = arith.constant 2.500000e-01 : f32
    %153 = vector.broadcast %cst_120 : f32 to vector<8x8xf32>
    %154 = arith.mulf %152, %153 : vector<8x8xf32>
    %155 = vector.broadcast %148 : vector<1x8xf32> to vector<8x8xf32>
    %156 = arith.addf %154, %155 : vector<8x8xf32>
    %cst_121 = arith.constant dense<0xFF800000> : vector<8xf32>
    %157 = vector.multi_reduction <maximumf>, %156, %cst_121 [1] : vector<8x8xf32> to vector<8xf32>
    %158 = vector.shape_cast %157 : vector<8xf32> to vector<8x1xf32>
    %159 = vector.broadcast %158 : vector<8x1xf32> to vector<8x8xf32>
    %160 = arith.subf %156, %159 : vector<8x8xf32>
    %161 = math.exp %160 : vector<8x8xf32>
    %cst_122 = arith.constant dense<0.000000e+00> : vector<8xf32>
    %162 = vector.multi_reduction <add>, %161, %cst_122 [1] : vector<8x8xf32> to vector<8xf32>
    %163 = vector.shape_cast %162 : vector<8xf32> to vector<8x1xf32>
    %164 = vector.broadcast %163 : vector<8x1xf32> to vector<8x8xf32>
    %165 = arith.divf %161, %164 : vector<8x8xf32>
    %cst_123 = arith.constant dense<0.000000e+00> : vector<8x16xf32>
    %166 = tpu.matmul %165, %151, %cst_123 {dimension_numbers = #tpu.dot_dimension_numbers<[1], [0], [0], [1], [0, 0, 1, 1], [], []>} : vector<8x8xf32>, vector<8x16xf32>, vector<8x16xf32> -> vector<8x16xf32>
    %c0_124 = arith.constant 0 : index
    %c0_125 = arith.constant 0 : index
    %167 = vector.load %arg13[%c0_124, %c0_125] : memref<16x32xf32, #tpu.memory_space<vmem>>, vector<8x16xf32>
    tpu.vector_store %arg13[%c0_124, %c0_125], %166 {strides = array<i32>} : memref<16x32xf32, #tpu.memory_space<vmem>>, vector<8x16xf32>,
    %168 = vector.extract_strided_slice %147 {offsets = [0, 16], sizes = [8, 16], strides = [1, 1]} : vector<16x96xf32> to vector<8x16xf32>
    %169 = vector.extract_strided_slice %147 {offsets = [0, 48], sizes = [8, 16], strides = [1, 1]} : vector<16x96xf32> to vector<8x16xf32>
    %170 = vector.extract_strided_slice %147 {offsets = [0, 80], sizes = [8, 16], strides = [1, 1]} : vector<16x96xf32> to vector<8x16xf32>
    %cst_126 = arith.constant dense<0.000000e+00> : vector<8x8xf32>
    %171 = tpu.matmul %168, %169, %cst_126 {dimension_numbers = #tpu.dot_dimension_numbers<[1], [1], [0], [0], [0, 0, 1, 0], [], []>} : vector<8x16xf32>, vector<8x16xf32>, vector<8x8xf32> -> vector<8x8xf32>
    %cst_127 = arith.constant 2.500000e-01 : f32
    %172 = vector.broadcast %cst_127 : f32 to vector<8x8xf32>
    %173 = arith.mulf %171, %172 : vector<8x8xf32>
    %174 = vector.broadcast %148 : vector<1x8xf32> to vector<8x8xf32>
    %175 = arith.addf %173, %174 : vector<8x8xf32>
    %cst_128 = arith.constant dense<0xFF800000> : vector<8xf32>
    %176 = vector.multi_reduction <maximumf>, %175, %cst_128 [1] : vector<8x8xf32> to vector<8xf32>
    %177 = vector.shape_cast %176 : vector<8xf32> to vector<8x1xf32>
    %178 = vector.broadcast %177 : vector<8x1xf32> to vector<8x8xf32>
    %179 = arith.subf %175, %178 : vector<8x8xf32>
    %180 = math.exp %179 : vector<8x8xf32>
    %cst_129 = arith.constant dense<0.000000e+00> : vector<8xf32>
    %181 = vector.multi_reduction <add>, %180, %cst_129 [1] : vector<8x8xf32> to vector<8xf32>
    %182 = vector.shape_cast %181 : vector<8xf32> to vector<8x1xf32>
    %183 = vector.broadcast %182 : vector<8x1xf32> to vector<8x8xf32>
    %184 = arith.divf %180, %183 : vector<8x8xf32>
    %cst_130 = arith.constant dense<0.000000e+00> : vector<8x16xf32>
    %185 = tpu.matmul %184, %170, %cst_130 {dimension_numbers = #tpu.dot_dimension_numbers<[1], [0], [0], [1], [0, 0, 1, 1], [], []>} : vector<8x8xf32>, vector<8x16xf32>, vector<8x16xf32> -> vector<8x16xf32>
    %c0_131 = arith.constant 0 : index
    %c16 = arith.constant 16 : index
    %186 = vector.load %arg13[%c0_131, %c16] : memref<16x32xf32, #tpu.memory_space<vmem>>, vector<8x16xf32>
    tpu.vector_store %arg13[%c0_131, %c16], %185 {strides = array<i32>} : memref<16x32xf32, #tpu.memory_space<vmem>>, vector<8x16xf32>,
    %187 = vector.extract_strided_slice %140 {offsets = [1, 0], sizes = [1, 8], strides = [1, 1]} : vector<2x8xf32> to vector<1x8xf32>
    %188 = vector.extract_strided_slice %147 {offsets = [8, 0], sizes = [8, 16], strides = [1, 1]} : vector<16x96xf32> to vector<8x16xf32>
    %189 = vector.extract_strided_slice %147 {offsets = [8, 32], sizes = [8, 16], strides = [1, 1]} : vector<16x96xf32> to vector<8x16xf32>
    %190 = vector.extract_strided_slice %147 {offsets = [8, 64], sizes = [8, 16], strides = [1, 1]} : vector<16x96xf32> to vector<8x16xf32>
    %cst_132 = arith.constant dense<0.000000e+00> : vector<8x8xf32>
    %191 = tpu.matmul %188, %189, %cst_132 {dimension_numbers = #tpu.dot_dimension_numbers<[1], [1], [0], [0], [0, 0, 1, 0], [], []>} : vector<8x16xf32>, vector<8x16xf32>, vector<8x8xf32> -> vector<8x8xf32>
    %cst_133 = arith.constant 2.500000e-01 : f32
    %192 = vector.broadcast %cst_133 : f32 to vector<8x8xf32>
    %193 = arith.mulf %191, %192 : vector<8x8xf32>
    %194 = vector.broadcast %187 : vector<1x8xf32> to vector<8x8xf32>
    %195 = arith.addf %193, %194 : vector<8x8xf32>
    %cst_134 = arith.constant dense<0xFF800000> : vector<8xf32>
    %196 = vector.multi_reduction <maximumf>, %195, %cst_134 [1] : vector<8x8xf32> to vector<8xf32>
    %197 = vector.shape_cast %196 : vector<8xf32> to vector<8x1xf32>
    %198 = vector.broadcast %197 : vector<8x1xf32> to vector<8x8xf32>
    %199 = arith.subf %195, %198 : vector<8x8xf32>
    %200 = math.exp %199 : vector<8x8xf32>
    %cst_135 = arith.constant dense<0.000000e+00> : vector<8xf32>
    %201 = vector.multi_reduction <add>, %200, %cst_135 [1] : vector<8x8xf32> to vector<8xf32>
    %202 = vector.shape_cast %201 : vector<8xf32> to vector<8x1xf32>
    %203 = vector.broadcast %202 : vector<8x1xf32> to vector<8x8xf32>
    %204 = arith.divf %200, %203 : vector<8x8xf32>
    %cst_136 = arith.constant dense<0.000000e+00> : vector<8x16xf32>
    %205 = tpu.matmul %204, %190, %cst_136 {dimension_numbers = #tpu.dot_dimension_numbers<[1], [0], [0], [1], [0, 0, 1, 1], [], []>} : vector<8x8xf32>, vector<8x16xf32>, vector<8x16xf32> -> vector<8x16xf32>
    %c8_137 = arith.constant 8 : index
    %c0_138 = arith.constant 0 : index
    %206 = vector.load %arg13[%c8_137, %c0_138] : memref<16x32xf32, #tpu.memory_space<vmem>>, vector<8x16xf32>
    tpu.vector_store %arg13[%c8_137, %c0_138], %205 {strides = array<i32>} : memref<16x32xf32, #tpu.memory_space<vmem>>, vector<8x16xf32>,
    %207 = vector.extract_strided_slice %147 {offsets = [8, 16], sizes = [8, 16], strides = [1, 1]} : vector<16x96xf32> to vector<8x16xf32>
    %208 = vector.extract_strided_slice %147 {offsets = [8, 48], sizes = [8, 16], strides = [1, 1]} : vector<16x96xf32> to vector<8x16xf32>
    %209 = vector.extract_strided_slice %147 {offsets = [8, 80], sizes = [8, 16], strides = [1, 1]} : vector<16x96xf32> to vector<8x16xf32>
    %cst_139 = arith.constant dense<0.000000e+00> : vector<8x8xf32>
    %210 = tpu.matmul %207, %208, %cst_139 {dimension_numbers = #tpu.dot_dimension_numbers<[1], [1], [0], [0], [0, 0, 1, 0], [], []>} : vector<8x16xf32>, vector<8x16xf32>, vector<8x8xf32> -> vector<8x8xf32>
    %cst_140 = arith.constant 2.500000e-01 : f32
    %211 = vector.broadcast %cst_140 : f32 to vector<8x8xf32>
    %212 = arith.mulf %210, %211 : vector<8x8xf32>
    %213 = vector.broadcast %187 : vector<1x8xf32> to vector<8x8xf32>
    %214 = arith.addf %212, %213 : vector<8x8xf32>
    %cst_141 = arith.constant dense<0xFF800000> : vector<8xf32>
    %215 = vector.multi_reduction <maximumf>, %214, %cst_141 [1] : vector<8x8xf32> to vector<8xf32>
    %216 = vector.shape_cast %215 : vector<8xf32> to vector<8x1xf32>
    %217 = vector.broadcast %216 : vector<8x1xf32> to vector<8x8xf32>
    %218 = arith.subf %214, %217 : vector<8x8xf32>
    %219 = math.exp %218 : vector<8x8xf32>
    %cst_142 = arith.constant dense<0.000000e+00> : vector<8xf32>
    %220 = vector.multi_reduction <add>, %219, %cst_142 [1] : vector<8x8xf32> to vector<8xf32>
    %221 = vector.shape_cast %220 : vector<8xf32> to vector<8x1xf32>
    %222 = vector.broadcast %221 : vector<8x1xf32> to vector<8x8xf32>
    %223 = arith.divf %219, %222 : vector<8x8xf32>
    %cst_143 = arith.constant dense<0.000000e+00> : vector<8x16xf32>
    %224 = tpu.matmul %223, %209, %cst_143 {dimension_numbers = #tpu.dot_dimension_numbers<[1], [0], [0], [1], [0, 0, 1, 1], [], []>} : vector<8x8xf32>, vector<8x16xf32>, vector<8x16xf32> -> vector<8x16xf32>
    %c8_144 = arith.constant 8 : index
    %c16_145 = arith.constant 16 : index
    %225 = vector.load %arg13[%c8_144, %c16_145] : memref<16x32xf32, #tpu.memory_space<vmem>>, vector<8x16xf32>
    tpu.vector_store %arg13[%c8_144, %c16_145], %224 {strides = array<i32>} : memref<16x32xf32, #tpu.memory_space<vmem>>, vector<8x16xf32>,
    %c0_146 = arith.constant 0 : index
    %c0_147 = arith.constant 0 : index
    %226 = vector.load %arg13[%c0_146, %c0_147] : memref<16x32xf32, #tpu.memory_space<vmem>>, vector<16x32xf32>
    %c0_148 = arith.constant 0 : index
    %c0_149 = arith.constant 0 : index
    %c0_150 = arith.constant 0 : index
    %227 = vector.load %arg5[%c0_148, %c0_149, %c0_150] : memref<2x32x32xf32, #tpu.memory_space<vmem>>, vector<1x32x32xf32>
    %228 = vector.shape_cast %227 : vector<1x32x32xf32> to vector<32x32xf32>
    %cst_151 = arith.constant dense<0.000000e+00> : vector<16x32xf32>
    %229 = tpu.matmul %226, %228, %cst_151 {dimension_numbers = #tpu.dot_dimension_numbers<[1], [0], [0], [1], [0, 0, 1, 1], [], []>} : vector<16x32xf32>, vector<32x32xf32>, vector<16x32xf32> -> vector<16x32xf32>
    %c0_152 = arith.constant 0 : index
    %c1_153 = arith.constant 1 : index
    %c0_154 = arith.constant 0 : index
    %230 = vector.load %arg8[%c0_152, %c1_153, %c0_154] : memref<2x8x96xf32, #tpu.memory_space<vmem>>, vector<1x1x32xf32>
    %231 = vector.shape_cast %230 : vector<1x1x32xf32> to vector<1x32xf32>
    %232 = vector.broadcast %231 : vector<1x32xf32> to vector<16x32xf32>
    %233 = arith.addf %229, %232 : vector<16x32xf32>
    %234 = arith.addf %233, %135 : vector<16x32xf32>
    %c0_155 = arith.constant 0 : index
    %c2_156 = arith.constant 2 : index
    %c0_157 = arith.constant 0 : index
    %235 = vector.load %arg8[%c0_155, %c2_156, %c0_157] : memref<2x8x96xf32, #tpu.memory_space<vmem>>, vector<1x1x32xf32>
    %236 = vector.shape_cast %235 : vector<1x1x32xf32> to vector<1x32xf32>
    %c0_158 = arith.constant 0 : index
    %c3_159 = arith.constant 3 : index
    %c0_160 = arith.constant 0 : index
    %237 = vector.load %arg8[%c0_158, %c3_159, %c0_160] : memref<2x8x96xf32, #tpu.memory_space<vmem>>, vector<1x1x32xf32>
    %238 = vector.shape_cast %237 : vector<1x1x32xf32> to vector<1x32xf32>
    %cst_161 = arith.constant dense<0.000000e+00> : vector<16xf32>
    %239 = vector.multi_reduction <add>, %234, %cst_161 [1] : vector<16x32xf32> to vector<16xf32>
    %240 = vector.shape_cast %239 : vector<16xf32> to vector<16x1xf32>
    %cst_162 = arith.constant 3.200000e+01 : f32
    %241 = vector.broadcast %cst_162 : f32 to vector<16x1xf32>
    %242 = arith.divf %240, %241 : vector<16x1xf32>
    %243 = vector.broadcast %242 : vector<16x1xf32> to vector<16x32xf32>
    %244 = arith.subf %234, %243 : vector<16x32xf32>
    %245 = arith.mulf %244, %244 : vector<16x32xf32>
    %cst_163 = arith.constant dense<0.000000e+00> : vector<16xf32>
    %246 = vector.multi_reduction <add>, %245, %cst_163 [1] : vector<16x32xf32> to vector<16xf32>
    %247 = vector.shape_cast %246 : vector<16xf32> to vector<16x1xf32>
    %cst_164 = arith.constant 3.200000e+01 : f32
    %248 = vector.broadcast %cst_164 : f32 to vector<16x1xf32>
    %249 = arith.divf %247, %248 : vector<16x1xf32>
    %cst_165 = arith.constant 9.99999996E-13 : f32
    %250 = vector.broadcast %cst_165 : f32 to vector<16x1xf32>
    %251 = arith.addf %249, %250 : vector<16x1xf32>
    %252 = math.rsqrt %251 : vector<16x1xf32>
    %253 = vector.broadcast %252 : vector<16x1xf32> to vector<16x32xf32>
    %254 = arith.mulf %244, %253 : vector<16x32xf32>
    %255 = vector.broadcast %236 : vector<1x32xf32> to vector<16x32xf32>
    %256 = arith.mulf %254, %255 : vector<16x32xf32>
    %257 = vector.broadcast %238 : vector<1x32xf32> to vector<16x32xf32>
    %258 = arith.addf %256, %257 : vector<16x32xf32>
    %c0_166 = arith.constant 0 : index
    %c0_167 = arith.constant 0 : index
    %c0_168 = arith.constant 0 : index
    %259 = vector.load %arg6[%c0_166, %c0_167, %c0_168] : memref<2x32x64xf32, #tpu.memory_space<vmem>>, vector<1x32x64xf32>
    %260 = vector.shape_cast %259 : vector<1x32x64xf32> to vector<32x64xf32>
    %cst_169 = arith.constant dense<0.000000e+00> : vector<16x64xf32>
    %261 = tpu.matmul %258, %260, %cst_169 {dimension_numbers = #tpu.dot_dimension_numbers<[1], [0], [0], [1], [0, 0, 1, 1], [], []>} : vector<16x32xf32>, vector<32x64xf32>, vector<16x64xf32> -> vector<16x64xf32>
    %c0_170 = arith.constant 0 : index
    %c4_171 = arith.constant 4 : index
    %c0_172 = arith.constant 0 : index
    %262 = vector.load %arg8[%c0_170, %c4_171, %c0_172] : memref<2x8x96xf32, #tpu.memory_space<vmem>>, vector<1x1x64xf32>
    %263 = vector.shape_cast %262 : vector<1x1x64xf32> to vector<1x64xf32>
    %264 = vector.broadcast %263 : vector<1x64xf32> to vector<16x64xf32>
    %265 = arith.addf %261, %264 : vector<16x64xf32>
    %cst_173 = arith.constant 5.000000e-01 : f32
    %266 = vector.broadcast %cst_173 : f32 to vector<16x64xf32>
    %267 = arith.mulf %266, %265 : vector<16x64xf32>
    %cst_174 = arith.constant 4.471500e-02 : f32
    %268 = vector.broadcast %cst_174 : f32 to vector<16x64xf32>
    %269 = arith.mulf %268, %265 : vector<16x64xf32>
    %270 = arith.mulf %269, %265 : vector<16x64xf32>
    %271 = arith.mulf %270, %265 : vector<16x64xf32>
    %272 = arith.addf %265, %271 : vector<16x64xf32>
    %cst_175 = arith.constant 0.797884583 : f32
    %273 = vector.broadcast %cst_175 : f32 to vector<16x64xf32>
    %274 = arith.mulf %273, %272 : vector<16x64xf32>
    %275 = math.tanh %274 : vector<16x64xf32>
    %cst_176 = arith.constant 1.000000e+00 : f32
    %276 = vector.broadcast %cst_176 : f32 to vector<16x64xf32>
    %277 = arith.addf %276, %275 : vector<16x64xf32>
    %278 = arith.mulf %267, %277 : vector<16x64xf32>
    %c0_177 = arith.constant 0 : index
    %c0_178 = arith.constant 0 : index
    %c0_179 = arith.constant 0 : index
    %279 = vector.load %arg7[%c0_177, %c0_178, %c0_179] : memref<2x64x32xf32, #tpu.memory_space<vmem>>, vector<1x64x32xf32>
    %280 = vector.shape_cast %279 : vector<1x64x32xf32> to vector<64x32xf32>
    %cst_180 = arith.constant dense<0.000000e+00> : vector<16x32xf32>
    %281 = tpu.matmul %278, %280, %cst_180 {dimension_numbers = #tpu.dot_dimension_numbers<[1], [0], [0], [1], [0, 0, 1, 1], [], []>} : vector<16x64xf32>, vector<64x32xf32>, vector<16x32xf32> -> vector<16x32xf32>
    %c0_181 = arith.constant 0 : index
    %c5_182 = arith.constant 5 : index
    %c0_183 = arith.constant 0 : index
    %282 = vector.load %arg8[%c0_181, %c5_182, %c0_183] : memref<2x8x96xf32, #tpu.memory_space<vmem>>, vector<1x1x32xf32>
    %283 = vector.shape_cast %282 : vector<1x1x32xf32> to vector<1x32xf32>
    %284 = vector.broadcast %283 : vector<1x32xf32> to vector<16x32xf32>
    %285 = arith.addf %281, %284 : vector<16x32xf32>
    %286 = arith.addf %285, %258 : vector<16x32xf32>
    %c0_184 = arith.constant 0 : index
    %c6_185 = arith.constant 6 : index
    %c0_186 = arith.constant 0 : index
    %287 = vector.load %arg8[%c0_184, %c6_185, %c0_186] : memref<2x8x96xf32, #tpu.memory_space<vmem>>, vector<1x1x32xf32>
    %288 = vector.shape_cast %287 : vector<1x1x32xf32> to vector<1x32xf32>
    %c0_187 = arith.constant 0 : index
    %c7_188 = arith.constant 7 : index
    %c0_189 = arith.constant 0 : index
    %289 = vector.load %arg8[%c0_187, %c7_188, %c0_189] : memref<2x8x96xf32, #tpu.memory_space<vmem>>, vector<1x1x32xf32>
    %290 = vector.shape_cast %289 : vector<1x1x32xf32> to vector<1x32xf32>
    %cst_190 = arith.constant dense<0.000000e+00> : vector<16xf32>
    %291 = vector.multi_reduction <add>, %286, %cst_190 [1] : vector<16x32xf32> to vector<16xf32>
    %292 = vector.shape_cast %291 : vector<16xf32> to vector<16x1xf32>
    %cst_191 = arith.constant 3.200000e+01 : f32
    %293 = vector.broadcast %cst_191 : f32 to vector<16x1xf32>
    %294 = arith.divf %292, %293 : vector<16x1xf32>
    %295 = vector.broadcast %294 : vector<16x1xf32> to vector<16x32xf32>
    %296 = arith.subf %286, %295 : vector<16x32xf32>
    %297 = arith.mulf %296, %296 : vector<16x32xf32>
    %cst_192 = arith.constant dense<0.000000e+00> : vector<16xf32>
    %298 = vector.multi_reduction <add>, %297, %cst_192 [1] : vector<16x32xf32> to vector<16xf32>
    %299 = vector.shape_cast %298 : vector<16xf32> to vector<16x1xf32>
    %cst_193 = arith.constant 3.200000e+01 : f32
    %300 = vector.broadcast %cst_193 : f32 to vector<16x1xf32>
    %301 = arith.divf %299, %300 : vector<16x1xf32>
    %cst_194 = arith.constant 9.99999996E-13 : f32
    %302 = vector.broadcast %cst_194 : f32 to vector<16x1xf32>
    %303 = arith.addf %301, %302 : vector<16x1xf32>
    %304 = math.rsqrt %303 : vector<16x1xf32>
    %305 = vector.broadcast %304 : vector<16x1xf32> to vector<16x32xf32>
    %306 = arith.mulf %296, %305 : vector<16x32xf32>
    %307 = vector.broadcast %288 : vector<1x32xf32> to vector<16x32xf32>
    %308 = arith.mulf %306, %307 : vector<16x32xf32>
    %309 = vector.broadcast %290 : vector<1x32xf32> to vector<16x32xf32>
    %310 = arith.addf %308, %309 : vector<16x32xf32>
    %c1_195 = arith.constant 1 : index
    %c0_196 = arith.constant 0 : index
    %c0_197 = arith.constant 0 : index
    %311 = vector.load %arg4[%c1_195, %c0_196, %c0_197] : memref<2x32x96xf32, #tpu.memory_space<vmem>>, vector<1x32x96xf32>
    %312 = vector.shape_cast %311 : vector<1x32x96xf32> to vector<32x96xf32>
    %cst_198 = arith.constant dense<0.000000e+00> : vector<16x96xf32>
    %313 = tpu.matmul %310, %312, %cst_198 {dimension_numbers = #tpu.dot_dimension_numbers<[1], [0], [0], [1], [0, 0, 1, 1], [], []>} : vector<16x32xf32>, vector<32x96xf32>, vector<16x96xf32> -> vector<16x96xf32>
    %c1_199 = arith.constant 1 : index
    %c0_200 = arith.constant 0 : index
    %c0_201 = arith.constant 0 : index
    %314 = vector.load %arg8[%c1_199, %c0_200, %c0_201] : memref<2x8x96xf32, #tpu.memory_space<vmem>>, vector<1x1x96xf32>
    %315 = vector.shape_cast %314 : vector<1x1x96xf32> to vector<1x96xf32>
    %316 = vector.broadcast %315 : vector<1x96xf32> to vector<16x96xf32>
    %317 = arith.addf %313, %316 : vector<16x96xf32>
    %318 = vector.extract_strided_slice %140 {offsets = [0, 0], sizes = [1, 8], strides = [1, 1]} : vector<2x8xf32> to vector<1x8xf32>
    %319 = vector.extract_strided_slice %317 {offsets = [0, 0], sizes = [8, 16], strides = [1, 1]} : vector<16x96xf32> to vector<8x16xf32>
    %320 = vector.extract_strided_slice %317 {offsets = [0, 32], sizes = [8, 16], strides = [1, 1]} : vector<16x96xf32> to vector<8x16xf32>
    %321 = vector.extract_strided_slice %317 {offsets = [0, 64], sizes = [8, 16], strides = [1, 1]} : vector<16x96xf32> to vector<8x16xf32>
    %cst_202 = arith.constant dense<0.000000e+00> : vector<8x8xf32>
    %322 = tpu.matmul %319, %320, %cst_202 {dimension_numbers = #tpu.dot_dimension_numbers<[1], [1], [0], [0], [0, 0, 1, 0], [], []>} : vector<8x16xf32>, vector<8x16xf32>, vector<8x8xf32> -> vector<8x8xf32>
    %cst_203 = arith.constant 2.500000e-01 : f32
    %323 = vector.broadcast %cst_203 : f32 to vector<8x8xf32>
    %324 = arith.mulf %322, %323 : vector<8x8xf32>
    %325 = vector.broadcast %318 : vector<1x8xf32> to vector<8x8xf32>
    %326 = arith.addf %324, %325 : vector<8x8xf32>
    %cst_204 = arith.constant dense<0xFF800000> : vector<8xf32>
    %327 = vector.multi_reduction <maximumf>, %326, %cst_204 [1] : vector<8x8xf32> to vector<8xf32>
    %328 = vector.shape_cast %327 : vector<8xf32> to vector<8x1xf32>
    %329 = vector.broadcast %328 : vector<8x1xf32> to vector<8x8xf32>
    %330 = arith.subf %326, %329 : vector<8x8xf32>
    %331 = math.exp %330 : vector<8x8xf32>
    %cst_205 = arith.constant dense<0.000000e+00> : vector<8xf32>
    %332 = vector.multi_reduction <add>, %331, %cst_205 [1] : vector<8x8xf32> to vector<8xf32>
    %333 = vector.shape_cast %332 : vector<8xf32> to vector<8x1xf32>
    %334 = vector.broadcast %333 : vector<8x1xf32> to vector<8x8xf32>
    %335 = arith.divf %331, %334 : vector<8x8xf32>
    %cst_206 = arith.constant dense<0.000000e+00> : vector<8x16xf32>
    %336 = tpu.matmul %335, %321, %cst_206 {dimension_numbers = #tpu.dot_dimension_numbers<[1], [0], [0], [1], [0, 0, 1, 1], [], []>} : vector<8x8xf32>, vector<8x16xf32>, vector<8x16xf32> -> vector<8x16xf32>
    %c0_207 = arith.constant 0 : index
    %c0_208 = arith.constant 0 : index
    %337 = vector.load %arg13[%c0_207, %c0_208] : memref<16x32xf32, #tpu.memory_space<vmem>>, vector<8x16xf32>
    tpu.vector_store %arg13[%c0_207, %c0_208], %336 {strides = array<i32>} : memref<16x32xf32, #tpu.memory_space<vmem>>, vector<8x16xf32>,
    %338 = vector.extract_strided_slice %317 {offsets = [0, 16], sizes = [8, 16], strides = [1, 1]} : vector<16x96xf32> to vector<8x16xf32>
    %339 = vector.extract_strided_slice %317 {offsets = [0, 48], sizes = [8, 16], strides = [1, 1]} : vector<16x96xf32> to vector<8x16xf32>
    %340 = vector.extract_strided_slice %317 {offsets = [0, 80], sizes = [8, 16], strides = [1, 1]} : vector<16x96xf32> to vector<8x16xf32>
    %cst_209 = arith.constant dense<0.000000e+00> : vector<8x8xf32>
    %341 = tpu.matmul %338, %339, %cst_209 {dimension_numbers = #tpu.dot_dimension_numbers<[1], [1], [0], [0], [0, 0, 1, 0], [], []>} : vector<8x16xf32>, vector<8x16xf32>, vector<8x8xf32> -> vector<8x8xf32>
    %cst_210 = arith.constant 2.500000e-01 : f32
    %342 = vector.broadcast %cst_210 : f32 to vector<8x8xf32>
    %343 = arith.mulf %341, %342 : vector<8x8xf32>
    %344 = vector.broadcast %318 : vector<1x8xf32> to vector<8x8xf32>
    %345 = arith.addf %343, %344 : vector<8x8xf32>
    %cst_211 = arith.constant dense<0xFF800000> : vector<8xf32>
    %346 = vector.multi_reduction <maximumf>, %345, %cst_211 [1] : vector<8x8xf32> to vector<8xf32>
    %347 = vector.shape_cast %346 : vector<8xf32> to vector<8x1xf32>
    %348 = vector.broadcast %347 : vector<8x1xf32> to vector<8x8xf32>
    %349 = arith.subf %345, %348 : vector<8x8xf32>
    %350 = math.exp %349 : vector<8x8xf32>
    %cst_212 = arith.constant dense<0.000000e+00> : vector<8xf32>
    %351 = vector.multi_reduction <add>, %350, %cst_212 [1] : vector<8x8xf32> to vector<8xf32>
    %352 = vector.shape_cast %351 : vector<8xf32> to vector<8x1xf32>
    %353 = vector.broadcast %352 : vector<8x1xf32> to vector<8x8xf32>
    %354 = arith.divf %350, %353 : vector<8x8xf32>
    %cst_213 = arith.constant dense<0.000000e+00> : vector<8x16xf32>
    %355 = tpu.matmul %354, %340, %cst_213 {dimension_numbers = #tpu.dot_dimension_numbers<[1], [0], [0], [1], [0, 0, 1, 1], [], []>} : vector<8x8xf32>, vector<8x16xf32>, vector<8x16xf32> -> vector<8x16xf32>
    %c0_214 = arith.constant 0 : index
    %c16_215 = arith.constant 16 : index
    %356 = vector.load %arg13[%c0_214, %c16_215] : memref<16x32xf32, #tpu.memory_space<vmem>>, vector<8x16xf32>
    tpu.vector_store %arg13[%c0_214, %c16_215], %355 {strides = array<i32>} : memref<16x32xf32, #tpu.memory_space<vmem>>, vector<8x16xf32>,
    %357 = vector.extract_strided_slice %140 {offsets = [1, 0], sizes = [1, 8], strides = [1, 1]} : vector<2x8xf32> to vector<1x8xf32>
    %358 = vector.extract_strided_slice %317 {offsets = [8, 0], sizes = [8, 16], strides = [1, 1]} : vector<16x96xf32> to vector<8x16xf32>
    %359 = vector.extract_strided_slice %317 {offsets = [8, 32], sizes = [8, 16], strides = [1, 1]} : vector<16x96xf32> to vector<8x16xf32>
    %360 = vector.extract_strided_slice %317 {offsets = [8, 64], sizes = [8, 16], strides = [1, 1]} : vector<16x96xf32> to vector<8x16xf32>
    %cst_216 = arith.constant dense<0.000000e+00> : vector<8x8xf32>
    %361 = tpu.matmul %358, %359, %cst_216 {dimension_numbers = #tpu.dot_dimension_numbers<[1], [1], [0], [0], [0, 0, 1, 0], [], []>} : vector<8x16xf32>, vector<8x16xf32>, vector<8x8xf32> -> vector<8x8xf32>
    %cst_217 = arith.constant 2.500000e-01 : f32
    %362 = vector.broadcast %cst_217 : f32 to vector<8x8xf32>
    %363 = arith.mulf %361, %362 : vector<8x8xf32>
    %364 = vector.broadcast %357 : vector<1x8xf32> to vector<8x8xf32>
    %365 = arith.addf %363, %364 : vector<8x8xf32>
    %cst_218 = arith.constant dense<0xFF800000> : vector<8xf32>
    %366 = vector.multi_reduction <maximumf>, %365, %cst_218 [1] : vector<8x8xf32> to vector<8xf32>
    %367 = vector.shape_cast %366 : vector<8xf32> to vector<8x1xf32>
    %368 = vector.broadcast %367 : vector<8x1xf32> to vector<8x8xf32>
    %369 = arith.subf %365, %368 : vector<8x8xf32>
    %370 = math.exp %369 : vector<8x8xf32>
    %cst_219 = arith.constant dense<0.000000e+00> : vector<8xf32>
    %371 = vector.multi_reduction <add>, %370, %cst_219 [1] : vector<8x8xf32> to vector<8xf32>
    %372 = vector.shape_cast %371 : vector<8xf32> to vector<8x1xf32>
    %373 = vector.broadcast %372 : vector<8x1xf32> to vector<8x8xf32>
    %374 = arith.divf %370, %373 : vector<8x8xf32>
    %cst_220 = arith.constant dense<0.000000e+00> : vector<8x16xf32>
    %375 = tpu.matmul %374, %360, %cst_220 {dimension_numbers = #tpu.dot_dimension_numbers<[1], [0], [0], [1], [0, 0, 1, 1], [], []>} : vector<8x8xf32>, vector<8x16xf32>, vector<8x16xf32> -> vector<8x16xf32>
    %c8_221 = arith.constant 8 : index
    %c0_222 = arith.constant 0 : index
    %376 = vector.load %arg13[%c8_221, %c0_222] : memref<16x32xf32, #tpu.memory_space<vmem>>, vector<8x16xf32>
    tpu.vector_store %arg13[%c8_221, %c0_222], %375 {strides = array<i32>} : memref<16x32xf32, #tpu.memory_space<vmem>>, vector<8x16xf32>,
    %377 = vector.extract_strided_slice %317 {offsets = [8, 16], sizes = [8, 16], strides = [1, 1]} : vector<16x96xf32> to vector<8x16xf32>
    %378 = vector.extract_strided_slice %317 {offsets = [8, 48], sizes = [8, 16], strides = [1, 1]} : vector<16x96xf32> to vector<8x16xf32>
    %379 = vector.extract_strided_slice %317 {offsets = [8, 80], sizes = [8, 16], strides = [1, 1]} : vector<16x96xf32> to vector<8x16xf32>
    %cst_223 = arith.constant dense<0.000000e+00> : vector<8x8xf32>
    %380 = tpu.matmul %377, %378, %cst_223 {dimension_numbers = #tpu.dot_dimension_numbers<[1], [1], [0], [0], [0, 0, 1, 0], [], []>} : vector<8x16xf32>, vector<8x16xf32>, vector<8x8xf32> -> vector<8x8xf32>
    %cst_224 = arith.constant 2.500000e-01 : f32
    %381 = vector.broadcast %cst_224 : f32 to vector<8x8xf32>
    %382 = arith.mulf %380, %381 : vector<8x8xf32>
    %383 = vector.broadcast %357 : vector<1x8xf32> to vector<8x8xf32>
    %384 = arith.addf %382, %383 : vector<8x8xf32>
    %cst_225 = arith.constant dense<0xFF800000> : vector<8xf32>
    %385 = vector.multi_reduction <maximumf>, %384, %cst_225 [1] : vector<8x8xf32> to vector<8xf32>
    %386 = vector.shape_cast %385 : vector<8xf32> to vector<8x1xf32>
    %387 = vector.broadcast %386 : vector<8x1xf32> to vector<8x8xf32>
    %388 = arith.subf %384, %387 : vector<8x8xf32>
    %389 = math.exp %388 : vector<8x8xf32>
    %cst_226 = arith.constant dense<0.000000e+00> : vector<8xf32>
    %390 = vector.multi_reduction <add>, %389, %cst_226 [1] : vector<8x8xf32> to vector<8xf32>
    %391 = vector.shape_cast %390 : vector<8xf32> to vector<8x1xf32>
    %392 = vector.broadcast %391 : vector<8x1xf32> to vector<8x8xf32>
    %393 = arith.divf %389, %392 : vector<8x8xf32>
    %cst_227 = arith.constant dense<0.000000e+00> : vector<8x16xf32>
    %394 = tpu.matmul %393, %379, %cst_227 {dimension_numbers = #tpu.dot_dimension_numbers<[1], [0], [0], [1], [0, 0, 1, 1], [], []>} : vector<8x8xf32>, vector<8x16xf32>, vector<8x16xf32> -> vector<8x16xf32>
    %c8_228 = arith.constant 8 : index
    %c16_229 = arith.constant 16 : index
    %395 = vector.load %arg13[%c8_228, %c16_229] : memref<16x32xf32, #tpu.memory_space<vmem>>, vector<8x16xf32>
    tpu.vector_store %arg13[%c8_228, %c16_229], %394 {strides = array<i32>} : memref<16x32xf32, #tpu.memory_space<vmem>>, vector<8x16xf32>,
    %c0_230 = arith.constant 0 : index
    %c0_231 = arith.constant 0 : index
    %396 = vector.load %arg13[%c0_230, %c0_231] : memref<16x32xf32, #tpu.memory_space<vmem>>, vector<16x32xf32>
    %c1_232 = arith.constant 1 : index
    %c0_233 = arith.constant 0 : index
    %c0_234 = arith.constant 0 : index
    %397 = vector.load %arg5[%c1_232, %c0_233, %c0_234] : memref<2x32x32xf32, #tpu.memory_space<vmem>>, vector<1x32x32xf32>
    %398 = vector.shape_cast %397 : vector<1x32x32xf32> to vector<32x32xf32>
    %cst_235 = arith.constant dense<0.000000e+00> : vector<16x32xf32>
    %399 = tpu.matmul %396, %398, %cst_235 {dimension_numbers = #tpu.dot_dimension_numbers<[1], [0], [0], [1], [0, 0, 1, 1], [], []>} : vector<16x32xf32>, vector<32x32xf32>, vector<16x32xf32> -> vector<16x32xf32>
    %c1_236 = arith.constant 1 : index
    %c1_237 = arith.constant 1 : index
    %c0_238 = arith.constant 0 : index
    %400 = vector.load %arg8[%c1_236, %c1_237, %c0_238] : memref<2x8x96xf32, #tpu.memory_space<vmem>>, vector<1x1x32xf32>
    %401 = vector.shape_cast %400 : vector<1x1x32xf32> to vector<1x32xf32>
    %402 = vector.broadcast %401 : vector<1x32xf32> to vector<16x32xf32>
    %403 = arith.addf %399, %402 : vector<16x32xf32>
    %404 = arith.addf %403, %310 : vector<16x32xf32>
    %c1_239 = arith.constant 1 : index
    %c2_240 = arith.constant 2 : index
    %c0_241 = arith.constant 0 : index
    %405 = vector.load %arg8[%c1_239, %c2_240, %c0_241] : memref<2x8x96xf32, #tpu.memory_space<vmem>>, vector<1x1x32xf32>
    %406 = vector.shape_cast %405 : vector<1x1x32xf32> to vector<1x32xf32>
    %c1_242 = arith.constant 1 : index
    %c3_243 = arith.constant 3 : index
    %c0_244 = arith.constant 0 : index
    %407 = vector.load %arg8[%c1_242, %c3_243, %c0_244] : memref<2x8x96xf32, #tpu.memory_space<vmem>>, vector<1x1x32xf32>
    %408 = vector.shape_cast %407 : vector<1x1x32xf32> to vector<1x32xf32>
    %cst_245 = arith.constant dense<0.000000e+00> : vector<16xf32>
    %409 = vector.multi_reduction <add>, %404, %cst_245 [1] : vector<16x32xf32> to vector<16xf32>
    %410 = vector.shape_cast %409 : vector<16xf32> to vector<16x1xf32>
    %cst_246 = arith.constant 3.200000e+01 : f32
    %411 = vector.broadcast %cst_246 : f32 to vector<16x1xf32>
    %412 = arith.divf %410, %411 : vector<16x1xf32>
    %413 = vector.broadcast %412 : vector<16x1xf32> to vector<16x32xf32>
    %414 = arith.subf %404, %413 : vector<16x32xf32>
    %415 = arith.mulf %414, %414 : vector<16x32xf32>
    %cst_247 = arith.constant dense<0.000000e+00> : vector<16xf32>
    %416 = vector.multi_reduction <add>, %415, %cst_247 [1] : vector<16x32xf32> to vector<16xf32>
    %417 = vector.shape_cast %416 : vector<16xf32> to vector<16x1xf32>
    %cst_248 = arith.constant 3.200000e+01 : f32
    %418 = vector.broadcast %cst_248 : f32 to vector<16x1xf32>
    %419 = arith.divf %417, %418 : vector<16x1xf32>
    %cst_249 = arith.constant 9.99999996E-13 : f32
    %420 = vector.broadcast %cst_249 : f32 to vector<16x1xf32>
    %421 = arith.addf %419, %420 : vector<16x1xf32>
    %422 = math.rsqrt %421 : vector<16x1xf32>
    %423 = vector.broadcast %422 : vector<16x1xf32> to vector<16x32xf32>
    %424 = arith.mulf %414, %423 : vector<16x32xf32>
    %425 = vector.broadcast %406 : vector<1x32xf32> to vector<16x32xf32>
    %426 = arith.mulf %424, %425 : vector<16x32xf32>
    %427 = vector.broadcast %408 : vector<1x32xf32> to vector<16x32xf32>
    %428 = arith.addf %426, %427 : vector<16x32xf32>
    %c1_250 = arith.constant 1 : index
    %c0_251 = arith.constant 0 : index
    %c0_252 = arith.constant 0 : index
    %429 = vector.load %arg6[%c1_250, %c0_251, %c0_252] : memref<2x32x64xf32, #tpu.memory_space<vmem>>, vector<1x32x64xf32>
    %430 = vector.shape_cast %429 : vector<1x32x64xf32> to vector<32x64xf32>
    %cst_253 = arith.constant dense<0.000000e+00> : vector<16x64xf32>
    %431 = tpu.matmul %428, %430, %cst_253 {dimension_numbers = #tpu.dot_dimension_numbers<[1], [0], [0], [1], [0, 0, 1, 1], [], []>} : vector<16x32xf32>, vector<32x64xf32>, vector<16x64xf32> -> vector<16x64xf32>
    %c1_254 = arith.constant 1 : index
    %c4_255 = arith.constant 4 : index
    %c0_256 = arith.constant 0 : index
    %432 = vector.load %arg8[%c1_254, %c4_255, %c0_256] : memref<2x8x96xf32, #tpu.memory_space<vmem>>, vector<1x1x64xf32>
    %433 = vector.shape_cast %432 : vector<1x1x64xf32> to vector<1x64xf32>
    %434 = vector.broadcast %433 : vector<1x64xf32> to vector<16x64xf32>
    %435 = arith.addf %431, %434 : vector<16x64xf32>
    %cst_257 = arith.constant 5.000000e-01 : f32
    %436 = vector.broadcast %cst_257 : f32 to vector<16x64xf32>
    %437 = arith.mulf %436, %435 : vector<16x64xf32>
    %cst_258 = arith.constant 4.471500e-02 : f32
    %438 = vector.broadcast %cst_258 : f32 to vector<16x64xf32>
    %439 = arith.mulf %438, %435 : vector<16x64xf32>
    %440 = arith.mulf %439, %435 : vector<16x64xf32>
    %441 = arith.mulf %440, %435 : vector<16x64xf32>
    %442 = arith.addf %435, %441 : vector<16x64xf32>
    %cst_259 = arith.constant 0.797884583 : f32
    %443 = vector.broadcast %cst_259 : f32 to vector<16x64xf32>
    %444 = arith.mulf %443, %442 : vector<16x64xf32>
    %445 = math.tanh %444 : vector<16x64xf32>
    %cst_260 = arith.constant 1.000000e+00 : f32
    %446 = vector.broadcast %cst_260 : f32 to vector<16x64xf32>
    %447 = arith.addf %446, %445 : vector<16x64xf32>
    %448 = arith.mulf %437, %447 : vector<16x64xf32>
    %c1_261 = arith.constant 1 : index
    %c0_262 = arith.constant 0 : index
    %c0_263 = arith.constant 0 : index
    %449 = vector.load %arg7[%c1_261, %c0_262, %c0_263] : memref<2x64x32xf32, #tpu.memory_space<vmem>>, vector<1x64x32xf32>
    %450 = vector.shape_cast %449 : vector<1x64x32xf32> to vector<64x32xf32>
    %cst_264 = arith.constant dense<0.000000e+00> : vector<16x32xf32>
    %451 = tpu.matmul %448, %450, %cst_264 {dimension_numbers = #tpu.dot_dimension_numbers<[1], [0], [0], [1], [0, 0, 1, 1], [], []>} : vector<16x64xf32>, vector<64x32xf32>, vector<16x32xf32> -> vector<16x32xf32>
    %c1_265 = arith.constant 1 : index
    %c5_266 = arith.constant 5 : index
    %c0_267 = arith.constant 0 : index
    %452 = vector.load %arg8[%c1_265, %c5_266, %c0_267] : memref<2x8x96xf32, #tpu.memory_space<vmem>>, vector<1x1x32xf32>
    %453 = vector.shape_cast %452 : vector<1x1x32xf32> to vector<1x32xf32>
    %454 = vector.broadcast %453 : vector<1x32xf32> to vector<16x32xf32>
    %455 = arith.addf %451, %454 : vector<16x32xf32>
    %456 = arith.addf %455, %428 : vector<16x32xf32>
    %c1_268 = arith.constant 1 : index
    %c6_269 = arith.constant 6 : index
    %c0_270 = arith.constant 0 : index
    %457 = vector.load %arg8[%c1_268, %c6_269, %c0_270] : memref<2x8x96xf32, #tpu.memory_space<vmem>>, vector<1x1x32xf32>
    %458 = vector.shape_cast %457 : vector<1x1x32xf32> to vector<1x32xf32>
    %c1_271 = arith.constant 1 : index
    %c7_272 = arith.constant 7 : index
    %c0_273 = arith.constant 0 : index
    %459 = vector.load %arg8[%c1_271, %c7_272, %c0_273] : memref<2x8x96xf32, #tpu.memory_space<vmem>>, vector<1x1x32xf32>
    %460 = vector.shape_cast %459 : vector<1x1x32xf32> to vector<1x32xf32>
    %cst_274 = arith.constant dense<0.000000e+00> : vector<16xf32>
    %461 = vector.multi_reduction <add>, %456, %cst_274 [1] : vector<16x32xf32> to vector<16xf32>
    %462 = vector.shape_cast %461 : vector<16xf32> to vector<16x1xf32>
    %cst_275 = arith.constant 3.200000e+01 : f32
    %463 = vector.broadcast %cst_275 : f32 to vector<16x1xf32>
    %464 = arith.divf %462, %463 : vector<16x1xf32>
    %465 = vector.broadcast %464 : vector<16x1xf32> to vector<16x32xf32>
    %466 = arith.subf %456, %465 : vector<16x32xf32>
    %467 = arith.mulf %466, %466 : vector<16x32xf32>
    %cst_276 = arith.constant dense<0.000000e+00> : vector<16xf32>
    %468 = vector.multi_reduction <add>, %467, %cst_276 [1] : vector<16x32xf32> to vector<16xf32>
    %469 = vector.shape_cast %468 : vector<16xf32> to vector<16x1xf32>
    %cst_277 = arith.constant 3.200000e+01 : f32
    %470 = vector.broadcast %cst_277 : f32 to vector<16x1xf32>
    %471 = arith.divf %469, %470 : vector<16x1xf32>
    %cst_278 = arith.constant 9.99999996E-13 : f32
    %472 = vector.broadcast %cst_278 : f32 to vector<16x1xf32>
    %473 = arith.addf %471, %472 : vector<16x1xf32>
    %474 = math.rsqrt %473 : vector<16x1xf32>
    %475 = vector.broadcast %474 : vector<16x1xf32> to vector<16x32xf32>
    %476 = arith.mulf %466, %475 : vector<16x32xf32>
    %477 = vector.broadcast %458 : vector<1x32xf32> to vector<16x32xf32>
    %478 = arith.mulf %476, %477 : vector<16x32xf32>
    %479 = vector.broadcast %460 : vector<1x32xf32> to vector<16x32xf32>
    %480 = arith.addf %478, %479 : vector<16x32xf32>
    %481 = vector.extract_strided_slice %480 {offsets = [0, 0], sizes = [1, 32], strides = [1, 1]} : vector<16x32xf32> to vector<1x32xf32>
    %482 = vector.extract_strided_slice %480 {offsets = [8, 0], sizes = [1, 32], strides = [1, 1]} : vector<16x32xf32> to vector<1x32xf32>
    %483 = tpu.concatenate %481, %482 in 0 : vector<1x32xf32>, vector<1x32xf32> -> vector<2x32xf32>
    %c0_279 = arith.constant 0 : index
    %c0_280 = arith.constant 0 : index
    %484 = vector.load %arg9[%c0_279, %c0_280] : memref<32x32xf32, #tpu.memory_space<vmem>>, vector<32x32xf32>
    %cst_281 = arith.constant dense<0.000000e+00> : vector<2x32xf32>
    %485 = tpu.matmul %483, %484, %cst_281 {dimension_numbers = #tpu.dot_dimension_numbers<[1], [0], [0], [1], [0, 0, 1, 1], [], []>} : vector<2x32xf32>, vector<32x32xf32>, vector<2x32xf32> -> vector<2x32xf32>
    %c3_282 = arith.constant 3 : index
    %c0_283 = arith.constant 0 : index
    %486 = vector.load %arg10[%c3_282, %c0_283] : memref<8x32xf32, #tpu.memory_space<vmem>>, vector<1x32xf32>
    %487 = vector.broadcast %486 : vector<1x32xf32> to vector<2x32xf32>
    %488 = arith.addf %485, %487 : vector<2x32xf32>
    %489 = math.tanh %488 : vector<2x32xf32>
    %c4_284 = arith.constant 4 : index
    %c0_285 = arith.constant 0 : index
    %490 = vector.load %arg10[%c4_284, %c0_285] : memref<8x32xf32, #tpu.memory_space<vmem>>, vector<1x32xf32>
    %491 = vector.broadcast %490 : vector<1x32xf32> to vector<2x32xf32>
    %492 = arith.mulf %489, %491 : vector<2x32xf32>
    %cst_286 = arith.constant dense<0.000000e+00> : vector<2xf32>
    %493 = vector.multi_reduction <add>, %492, %cst_286 [1] : vector<2x32xf32> to vector<2xf32>
    %494 = vector.shape_cast %493 : vector<2xf32> to vector<2x1xf32>
    %c5_287 = arith.constant 5 : index
    %c0_288 = arith.constant 0 : index
    %495 = vector.load %arg10[%c5_287, %c0_288] : memref<8x32xf32, #tpu.memory_space<vmem>>, vector<1x1xf32>
    %496 = vector.broadcast %495 : vector<1x1xf32> to vector<2x1xf32>
    %497 = arith.addf %494, %496 : vector<2x1xf32>
    %cst_289 = arith.constant 0.000000e+00 : f32
    %498 = vector.broadcast %cst_289 : f32 to vector<2x1xf32>
    %499 = arith.subf %498, %497 : vector<2x1xf32>
    %500 = math.exp %499 : vector<2x1xf32>
    %cst_290 = arith.constant 1.000000e+00 : f32
    %501 = vector.broadcast %cst_290 : f32 to vector<2x1xf32>
    %502 = arith.addf %501, %500 : vector<2x1xf32>
    %cst_291 = arith.constant 1.000000e+00 : f32
    %503 = vector.broadcast %cst_291 : f32 to vector<2x1xf32>
    %504 = arith.divf %503, %502 : vector<2x1xf32>
    %505 = vector.shape_cast %504 : vector<2x1xf32> to vector<2x1xf32>
    %506 = vector.broadcast %505 : vector<2x1xf32> to vector<2x128xf32>
    %c0_292 = arith.constant 0 : index
    %c0_293 = arith.constant 0 : index
    %507 = vector.load %arg11[%c0_292, %c0_293] : memref<2x128xf32, #tpu.memory_space<vmem>>, vector<2x128xf32>
    tpu.vector_store %arg11[%c0_292, %c0_293], %506 {strides = array<i32>} : memref<2x128xf32, #tpu.memory_space<vmem>>, vector<2x128xf32>,
    return
  }
}

</mosaic_0001>

<bundles_post_ra>
// kernel: legal_bert_binary_cls_forward.1
= control target key start
LH: loop header
LB: loop body
LE: loop exit
PB: predicated region body
PF: predicated region fallthrough
CT: control target
= control target key end

     0   :  { %16 = vsyncpa [#allocation6], 0  ;;  %s3934_s0 = inlined_call_operand.vmem [shape: s32[2,8], index: 0, kind: input, shape index: {}]   ;;  %s3935_s1 = inlined_call_operand.vmem [shape: f32[2,8], index: 1, kind: input, shape index: {}]   ;;  %s3936_s2 = inlined_call_operand.vmem [shape: f32[64,32], index: 2, kind: input, shape index: {}]   ;;  %s3937_s3 = inlined_call_operand.hbm [shape: f32[16,32], index: 3, kind: input, shape index: {}]   ;;  %s3938_s4 = inlined_call_operand.vmem [shape: f32[2,32,96], index: 4, kind: input, shape index: {}]   ;;  %s3939_s5 = inlined_call_operand.vmem [shape: f32[2,32,32], index: 5, kind: input, shape index: {}]   ;;  %s3940_s6 = inlined_call_operand.vmem [shape: f32[2,32,64], index: 6, kind: input, shape index: {}]   ;;  %s3941_s7 = inlined_call_operand.vmem [shape: f32[2,64,32], index: 7, kind: input, shape index: {}]   ;;  %s3942_s8 = inlined_call_operand.hbm [shape: f32[2,8,96], index: 8, kind: input, shape index: {}]   ;;  %s3943_s9 = inlined_call_operand.vmem [shape: f32[32,32], index: 9, kind: input, shape index: {}]   ;;  %s3944_s10 = inlined_call_operand.hbm [shape: f32[8,32], index: 10, kind: input, shape index: {}]   ;;  %s3945_s11 = inlined_call_operand.vmem [shape: f32[2,128], index: 11, kind: output, shape index: {}]  }
   0x1   :  { %17 = vsyncpa [#allocation5], 0 }
   0x2   :  { %18 = vsyncpa [#allocation9], 0  ;;  %s25_s19 = sshll.u32 %s3934_s0, 4  ;;  %s3338_s20 = smov [#allocation8]   ;;  %s26_s19 = int_to_ptr.vmem [resolvable:$true] %s25_s19 }
   0x3   :  { %s58_s21 = sshll.u32 %s3338_s20, 4  ;;  %s3254_s24 = scalar_lea.hbm %s3942_s8, 256  ;;  %s59_s21 = int_to_ptr.vmem [resolvable:$true] %s58_s21 }
   0x4   :  { %p3255_p0 = scmp.ne.s32.totalorder %s3942_s8, %s3254_s24  ;;  %p3258_p1 = scmp.lt.u32.totalorder %s3254_s24, %s3942_s8 }
   0x6   :  { %p3260_p2 = pnand %p3258_p1, %p3255_p0 }
   0x8   :  { %3263 = shalt.err (!%p3260_p2)
}
   0x9   :  { %s3264_s29 = scalar_lea.vmem %s59_s21, 256  ;;  %p3269_p4 = scmp.lt.s32.totalorder %s59_s21, %s59_s21 }
   0xa   :  { %p3265_p3 = scmp.ne.s32.totalorder %s59_s21, %s3264_s29  ;;  %p3270_p5 = scmp.lt.s32.totalorder %s3264_s29, %s3264_s29 }
   0xc   :  { %p3271_p6 = por %p3270_p5, %p3269_p4 }
   0xe   :  { %p3272_p7 = pnand %p3271_p6, %p3265_p3 }
  0x10   :  { %3275 = shalt.err (!%p3272_p7)
}
  0x11   :  { %s3339_s0 = smov 128   ;;  %s3340_s30 = smov 8  }
  0x12   :  { %64 = dma.hbm_to_vmem [thread:$0]  %s3942_s8, 256, %s59_s21, [#allocation9], %s3339_s0, %s3339_s0, %s3340_s30  }
  0x13   :  { %s3276_s14 = scalar_lea.vmem %s26_s19, 32  ;;  %p3281_p9 = scmp.lt.s32.totalorder %s26_s19, %s26_s19 }
  0x14   :  { %p3277_p8 = scmp.ne.s32.totalorder %s26_s19, %s3276_s14  ;;  %p3282_p10 = scmp.lt.s32.totalorder %s3276_s14, %s3276_s14 }
  0x16   :  { %p3283_p11 = por %p3282_p10, %p3281_p9 }
  0x18   :  { %p3284_p12 = pnand %p3283_p11, %p3277_p8 }
  0x1a   :  { %3287 = shalt.err (!%p3284_p12)
}
  0x1b   :  { %s3341_s15 = smov [#allocation4]   ;;  %s3342_s16 = smov [#allocation7]  }
  0x1c   :  { %28 = dma.vmem_to_smem %s26_s19, 32, %s3341_s15, [#allocation6]  }
  0x1d   :  { %s38_s17 = sshll.u32 %s3342_s16, 4  ;;  %s3343_s18 = smov [#allocation10]   ;;  %s39_s17 = int_to_ptr.vmem [resolvable:$true] %s38_s17 }
  0x1e   :  { %s73_s20 = sshll.u32 %s3343_s18, 4  ;;  %s3288_s24 = scalar_lea.hbm %s3937_s3, 256  ;;  %s74_s20 = int_to_ptr.vmem [resolvable:$true] %s73_s20 }
  0x1f   :  { %p3289_p13 = scmp.ne.s32.totalorder %s3937_s3, %s3288_s24  ;;  %p3292_p0 = scmp.lt.u32.totalorder %s3288_s24, %s3937_s3 }
  0x21   :  { %p3294_p1 = pnand %p3292_p0, %p3289_p13 }
  0x23   :  { %3297 = shalt.err (!%p3294_p1)
}
  0x24   :  { %s3298_s19 = scalar_lea.vmem %s39_s17, 256  ;;  %p3303_p3 = scmp.lt.s32.totalorder %s39_s17, %s39_s17 }
  0x25   :  { %p3299_p2 = scmp.ne.s32.totalorder %s39_s17, %s3298_s19  ;;  %p3304_p4 = scmp.lt.s32.totalorder %s3298_s19, %s3298_s19 }
  0x27   :  { %p3305_p5 = por %p3304_p4, %p3303_p3 }
  0x29   :  { %p3306_p6 = pnand %p3305_p5, %p3299_p2 }
  0x2b   :  { %3309 = shalt.err (!%p3306_p6)
}
  0x2c   :  { %44 = dma.hbm_to_vmem [thread:$0]  %s3937_s3, 256, %s39_s17, [#allocation5], %s3339_s0, %s3339_s0, %s3340_s30  }
  0x2d   :  { %s3310_s13 = scalar_lea.hbm %s3944_s10, 128 }
  0x2e   :  { %p3311_p7 = scmp.ne.s32.totalorder %s3944_s10, %s3310_s13  ;;  %p3314_p8 = scmp.lt.u32.totalorder %s3310_s13, %s3944_s10 }
  0x30   :  { %p3316_p9 = pnand %p3314_p8, %p3311_p7 }
  0x32   :  { %3319 = shalt.err (!%p3316_p9)
}
  0x33   :  { %s3320_s22 = scalar_lea.vmem %s74_s20, 128  ;;  %p3325_p11 = scmp.lt.s32.totalorder %s74_s20, %s74_s20 }
  0x34   :  { %p3321_p10 = scmp.ne.s32.totalorder %s74_s20, %s3320_s22  ;;  %p3326_p12 = scmp.lt.s32.totalorder %s3320_s22, %s3320_s22 }
  0x36   :  { %p3327_p13 = por %p3326_p12, %p3325_p11 }
  0x38   :  { %p3328_p0 = pnand %p3327_p13, %p3321_p10 }
  0x3a   :  { %3331 = shalt.err (!%p3328_p0)
}
  0x3b   :  { %76 = dma.hbm_to_vmem [thread:$0]  %s3944_s10, 128, %s74_s20, [#allocation9]  }
  0x3c   :  { %3332 = dma.done.wait [#allocation6], 32  }
  0x3d   :  { %3333 = vsyncadd [#allocation6], 4294967264 }
  0x3e   :  { %3334 = dma.done.wait [#allocation5], 256  }
  0x3f   :  { %3335 = vsyncadd [#allocation5], 4294967040 }
  0x40   :  { %3336 = dma.done.wait [#allocation9], 384  }
  0x41   :  { %3337 = vsyncadd [#allocation9], 4294966912 }
  0x42   :  { %89 = sfence }
  0x43   :  { %s91_s30 = sld [smem:[#allocation4]]  ;;  %s2699_s17 = sld [smem:[#allocation4 + $0x1]]  ;;  %v94_v0 = vld [vmem:[#allocation7] sm:$0x1]  ;;  %v3465_v1 = vld [vmem:[#allocation10 + $0x2] sm:$0x1] }
  0x44   :  { %s2700_s23 = sld [smem:[#allocation4 + $0x2]]  ;;  %s2701_s24 = sld [smem:[#allocation4 + $0x3]]  ;;  %vm97_vm0 = vcmask 253952   ;;  %v102_v2 = vld [vmem:[#allocation7 + $0x1] sm:$0x1]  ;;  %vm208_vm1 = vcmask 261120  }
  0x45   :  { %s3459_s8 = sld [smem:[#allocation4 + $0x4]]  ;;  %s3461_s21 = sld [smem:[#allocation4 + $0x5]]  ;;  %v109_v3 = vld [vmem:[#allocation7 + $0x2] sm:$0x1]  ;;  %v116_v4 = vld [vmem:[#allocation7 + $0x3] sm:$0x1] }
  0x46   :  { %s3463_s25 = sld [smem:[#allocation4 + $0x6]]  ;;  %s3467_s10 = sld [smem:[#allocation4 + $0x7]]  ;;  %v123_v6 = vld [vmem:[#allocation7 + $0x4] sm:$0x1]  ;;  %v130_v9 = vld [vmem:[#allocation7 + $0x5] sm:$0x1] }
  0x47   :  { %s3472_s27 = sld [smem:[#allocation4 + $0x80]]  ;;  %s3477_s13 = sld [smem:[#allocation4 + $0x81]]  ;;  %v137_v10 = vld [vmem:[#allocation7 + $0x6] sm:$0x1]  ;;  %v144_v18 = vld [vmem:[#allocation7 + $0x7] sm:$0x1] }
  0x48   :  { %s3489_s20 = sld [smem:[#allocation4 + $0x82]]  ;;  %v151_v19 = vld [vmem:[#allocation7] sm:$0x1]  ;;  %s3505_s15 = sld [smem:[#allocation4 + $0x83]]  ;;  %v158_v29 = vld [vmem:[#allocation7 + $0x1] sm:$0x1] }
  0x49   :  { %s92_s19 = scalar_lea.vmem %s3936_s2, %s91_s30  ;;  %s100_s12 = scalar_lea.vmem %s3936_s2, %s2699_s17  ;;  %v165_v33 = vld [vmem:[#allocation7 + $0x2] sm:$0x1]  ;;  %v172_v42 = vld [vmem:[#allocation7 + $0x3] sm:$0x1]  ;;  %v179_v45 = vld [vmem:[#allocation7 + $0x4] sm:$0x1] }
  0x4a   :  { %v93_v5 = vld [vmem:[%s92_s19] sm:$0x1]  ;;  %s107_s16 = scalar_lea.vmem %s3936_s2, %s2700_s23  ;;  %s114_s3 = scalar_lea.vmem %s3936_s2, %s2701_s24  ;;  %v186_v47 = vld [vmem:[#allocation7 + $0x5] sm:$0x1]  ;;  %v193_v51 = vld [vmem:[#allocation7 + $0x6] sm:$0x1] }
  0x4b   :  { %v95_v7 = vadd.f32 %v94_v0, %v93_v5  ;;  %v101_v8 = vld [vmem:[%s100_s12] sm:$0x1]  ;;  %s121_s17 = scalar_lea.vmem %s3936_s2, %s3459_s8  ;;  %s128_s24 = scalar_lea.vmem %s3936_s2, %s3461_s21  ;;  %v200_v52 = vld [vmem:[#allocation7 + $0x7] sm:$0x1]  ;;  %vm3345_vm2 = vmmov 0   ;;  %vm344_vm3 = vcmask 130048  }
  0x4c   :  { %v103_v11 = vadd.f32 %v102_v2, %v101_v8  ;;  %v108_v12 = vld [vmem:[%s107_s16] sm:$0x1]  ;;  %s135_s29 = scalar_lea.vmem %s3936_s2, %s3463_s25  ;;  %s142_s14 = scalar_lea.vmem %s3936_s2, %s3467_s10  ;;  %vm425_vm4 = vcmask 64512   ;;  %vm685_vm5 = vcmask 261248   ;;  %vm1285_vm6 = vcmask 523264  }
  0x4d   :  { %v115_v13 = vld [vmem:[%s114_s3] sm:$0x1]  ;;  %v96_v14 = vadd.f32 %v95_v7, %v3465_v1  ;;  %v110_v15 = vadd.f32 %v109_v3, %v108_v12  ;;  %s149_s16 = scalar_lea.vmem %s3936_s2, %s3472_s27  ;;  %s3514_s18 = sld [smem:[#allocation4 + $0x84]]  ;;  %vm2563_vm7 = vcmask 1040384   ;;  %vm2654_vm8 = vcmask 254976  }
  0x4e   :  { %v117_v16 = vadd.f32 %v116_v4, %v115_v13  ;;  %v122_v17 = vld [vmem:[%s121_s17] sm:$0x1]  ;;  %v104_v20 = vadd.f32 %v103_v11, %v3465_v1  ;;  %s156_s3 = scalar_lea.vmem %s3936_s2, %s3477_s13  ;;  %s3522_s0 = sld [smem:[#allocation4 + $0x85]] }
  0x4f   :  { %v124_v21 = vadd.f32 %v123_v6, %v122_v17  ;;  %v129_v22 = vld [vmem:[%s128_s24] sm:$0x1]  ;;  %98 = vst.msk [vmem:[#allocation2] sm:$0x1] %vm97_vm0, %v96_v14  ;;  %v111_v24 = vadd.f32 %v110_v15, %v3465_v1  ;;  %s3528_s27 = sld [smem:[#allocation4 + $0x86]]  ;;  %s3530_s30 = sld [smem:[#allocation4 + $0x87]] }
  0x50   :  { %v136_v23 = vld [vmem:[%s135_s29] sm:$0x1]  ;;  %v118_v25 = vadd.f32 %v117_v16, %v3465_v1  ;;  %v131_v26 = vadd.f32 %v130_v9, %v129_v22  ;;  %105 = vst.msk [vmem:[#allocation2 + $0x1] sm:$0x1] %vm97_vm0, %v104_v20  ;;  %s163_s23 = scalar_lea.vmem %s3936_s2, %s3489_s20  ;;  %s170_s19 = scalar_lea.vmem %s3936_s2, %s3505_s15  ;;  %v252_v16 = vld [vmem:[%s3938_s4 + $0x8] sm:$0xff]  ;;  %v253_v17 = vld [vmem:[%s3938_s4 + $0x10] sm:$0xff] }
  0x51   :  { %v138_v27 = vadd.f32 %v137_v10, %v136_v23  ;;  %v143_v28 = vld [vmem:[%s142_s14] sm:$0x1]  ;;  %v125_v30 = vadd.f32 %v124_v21, %v3465_v1  ;;  %112 = vst.msk [vmem:[#allocation2 + $0x2] sm:$0x1] %vm97_vm0, %v111_v24  ;;  %s3347_s26 = smov 80   ;;  %s3348_s24 = smov 112  }
  0x52   :  { %v145_v31 = vadd.f32 %v144_v18, %v143_v28  ;;  %v150_v32 = vld [vmem:[%s149_s16] sm:$0x1]  ;;  %119 = vst.msk [vmem:[#allocation2 + $0x3] sm:$0x1] %vm97_vm0, %v118_v25  ;;  %v132_v34 = vadd.f32 %v131_v26, %v3465_v1  ;;  %s3350_s28 = smov 48  }
  0x53   :  { %v139_v35 = vadd.f32 %v138_v27, %v3465_v1  ;;  %v152_v36 = vadd.f32 %v151_v19, %v150_v32  ;;  %v157_v37 = vld [vmem:[%s156_s3] sm:$0x1]  ;;  %126 = vst.msk [vmem:[#allocation2 + $0x4] sm:$0x1] %vm97_vm0, %v125_v30  ;;  %s177_s29 = scalar_lea.vmem %s3936_s2, %s3514_s18  ;;  %v254_v19 = vld [vmem:[%s3938_s4 + $0x18] sm:$0xff]  ;;  %s3351_s18 = smov 16  }
  0x54   :  { %v146_v38 = vadd.f32 %v145_v31, %v3465_v1  ;;  %v159_v39 = vadd.f32 %v158_v29, %v157_v37  ;;  %133 = vst.msk [vmem:[#allocation2 + $0x5] sm:$0x1] %vm97_vm0, %v132_v34  ;;  %v164_v41 = vld [vmem:[%s163_s23] sm:$0x1]  ;;  %s184_s14 = scalar_lea.vmem %s3936_s2, %s3522_s0  ;;  %v3088_v20 = vpack.c.bf16 %v254_v19, %v253_v17  ;;  %v2715_v30 = vld [vmem:[#allocation10 + $0x1] ss:$0 sm:$0xff] }
  0x55   :  { %140 = vst.msk [vmem:[#allocation2 + $0x6] sm:$0x1] %vm97_vm0, %v139_v35  ;;  %v153_v40 = vadd.f32 %v152_v36, %v3465_v1  ;;  %v166_v44 = vadd.f32 %v165_v33, %v164_v41  ;;  %v171_v46 = vld [vmem:[%s170_s19] sm:$0x1]  ;;  %s191_s25 = scalar_lea.vmem %s3936_s2, %s3528_s27  ;;  %s198_s10 = scalar_lea.vmem %s3936_s2, %s3530_s30  ;;  %v3344_v37 = vmov 0.0  }
  0x56   :  { %147 = vst.msk [vmem:[#allocation2 + $0x7] sm:$0x1] %vm97_vm0, %v146_v38  ;;  %v160_v43 = vadd.f32 %v159_v39, %v3465_v1  ;;  %v173_v49 = vadd.f32 %v172_v42, %v171_v46  ;;  %v178_v50 = vld [vmem:[%s177_s29] sm:$0x1]  ;;  %2900 = vmatprep.subr.mxu1 %v3344_v37  ;;  %2902 = vmatprep.mubr.msk.f32.mxu1 %vm3345_vm2, %v3344_v37  ;;  %v2716_v38 = vld [vmem:[#allocation8] ss:$0 sm:$0xff]  ;;  %v420_v46 = vlaneseq }
  0x57   :  { %154 = vst.msk [vmem:[#allocation2 + $0x8] sm:$0x1] %vm97_vm0, %v153_v40  ;;  %v167_v48 = vadd.f32 %v166_v44, %v3465_v1  ;;  %v180_v53 = vadd.f32 %v179_v45, %v178_v50  ;;  %v185_v54 = vld [vmem:[%s184_s14] sm:$0x1]  ;;  %s3346_s23 = smov 96  }
  0x58   :  { %161 = vst.msk [vmem:[#allocation2 + $0x9] sm:$0x1] %vm97_vm0, %v160_v43  ;;  %v174_v55 = vadd.f32 %v173_v49, %v3465_v1  ;;  %v187_v56 = vadd.f32 %v186_v47, %v185_v54  ;;  %v192_v57 = vld [vmem:[%s191_s25] sm:$0x1]  ;;  %v421_v49 = vshrl.u32 %v420_v46, 7 }
  0x59   :  { %168 = vst.msk [vmem:[#allocation2 + $0xa] sm:$0x1] %vm97_vm0, %v167_v48  ;;  %v199_v58 = vld [vmem:[%s198_s10] sm:$0x1]  ;;  %v181_v59 = vadd.f32 %v180_v53, %v3465_v1  ;;  %v194_v60 = vadd.f32 %v193_v51, %v192_v57 }
  0x5a   :  { %v201_v61 = vadd.f32 %v200_v52, %v199_v58  ;;  %175 = vst.msk [vmem:[#allocation2 + $0xb] sm:$0x1] %vm97_vm0, %v174_v55  ;;  %v188_v62 = vadd.f32 %v187_v56, %v3465_v1  ;;  %v251_v15 = vld [vmem:[%s3938_s4] sm:$0xff]  ;;  %v422_v51 = vsub.s32 0, %v421_v49  ;;  %v767_v57 = vsub.s32 1, %v421_v49 }
  0x5b   :  { %182 = vst.msk [vmem:[#allocation2 + $0xc] sm:$0x1] %vm97_vm0, %v181_v59  ;;  %v195_v0 = vadd.f32 %v194_v60, %v3465_v1  ;;  %v3084_v18 = vpack.c.bf16 %v252_v16, %v251_v15  ;;  %v2714_v28 = vld [vmem:[#allocation10] ss:$0 sm:$0xff] }
  0x5c   :  { %v202_v2 = vadd.f32 %v201_v61, %v3465_v1  ;;  %189 = vst.msk [vmem:[#allocation2 + $0xd] sm:$0x1] %vm97_vm0, %v188_v62  ;;  %v248_v47 = vld [vmem:[%s3935_s1] sm:$0x3]  ;;  %s3349_s1 = smov 64  }
  0x5d   :  { %v204_v63 = vld [vmem:[#allocation2] sm:$0xff]  ;;  %196 = vst.msk [vmem:[#allocation2 + $0xe] sm:$0x1] %vm97_vm0, %v195_v0  ;;  %3085 = vmatprep.subr.bf16.mxu0 %v3084_v18  ;;  %v249_v48 = vsub.f32 1.0, %v248_v47 }
  0x5e   :  { %v209_v3 = vsel %vm208_vm1, %v204_v63, 0.0  ;;  %203 = vst.msk [vmem:[#allocation2 + $0xf] sm:$0x1] %vm97_vm0, %v202_v2  ;;  %3087 = vmatpush3.bf16.msra.mxu0 %v3084_v18 }
  0x5f   :  { %210 = vadd.xlane.f32.xlu0 %v209_v3  ;;  %3089 = vmatprep.subr.bf16.mxu0 %v3088_v20  ;;  %v250_v50 = vmul.f32 -10000.0, %v249_v48 }
  0x61   :  { %v3634_v52 = vrot.slane %v250_v50, %v422_v51  ;;  %v3638_v59 = vrot.slane %v250_v50, %v767_v57  ;;  %v1033_v57 = vld [vmem:[%s3939_s5 + $0x8] sm:$0xff] }
  0x62   :  { %3091 = vmatpush3.bf16.msra.mxu0 %v3088_v20 }
  0x63   :  { %2920 = vmatprep.subr.mxu0 %v3344_v37 }
  0x65   :  { %v205_v4 = vld [vmem:[#allocation2 + $0x8] sm:$0xff] }
  0x66   :  { %v212_v5 = vsel %vm208_vm1, %v205_v4, 0.0 }
  0x67   :  { %213 = vadd.xlane.f32.xlu0 %v212_v5 }
  0xec   :  { %v211_v6 = vpop.xlane.xlu0 %210 }
  0xed   :  { %v216_v7 = vmul.f32 0.03125, %v211_v6 }
  0xef   :  { %v218_v8 = vsub.f32 %v204_v63, %v216_v7 }
  0xf1   :  { %v220_v9 = vmul.f32 %v218_v8, %v218_v8 }
  0xf3   :  { %v222_v10 = vsel %vm208_vm1, %v220_v9, 0.0 }
  0xf4   :  { %223 = vadd.xlane.f32.xlu1 %v222_v10  ;;  %v214_v1 = vpop.xlane.xlu0 %213 }
  0xf5   :  { %v217_v11 = vmul.f32 0.03125, %v214_v1 }
  0xf7   :  { %v219_v12 = vsub.f32 %v205_v4, %v217_v11 }
  0xf9   :  { %v221_v13 = vmul.f32 %v219_v12, %v219_v12 }
  0xfb   :  { %v225_v14 = vsel %vm208_vm1, %v221_v13, 0.0 }
  0xfc   :  { %226 = vadd.xlane.f32.xlu1 %v225_v14 }
 0x181   :  { %v224_v21 = vpop.xlane.xlu1 %223 }
 0x182   :  { %v228_v22 = vmul.f32 0.03125, %v224_v21 }
 0x184   :  { %v230_v23 = vadd.f32 1e-12, %v228_v22 }
 0x186   :  { %3188 = vrsqrt.f32 %v230_v23 }
 0x189   :  { %v227_v24 = vpop.xlane.xlu1 %226 }
 0x18a   :  { %v229_v25 = vmul.f32 0.03125, %v227_v24 }
 0x18c   :  { %v231_v26 = vadd.f32 1e-12, %v229_v25 }
 0x18e   :  { %3190 = vrsqrt.f32 %v231_v26 }
 0x190   :  { %v3189_v27 = vpop.eup %3188 }
 0x191   :  { %v234_v29 = vmul.f32 %v3189_v27, %v218_v8 }
 0x193   :  { %v240_v31 = vmul.f32 %v2714_v28, %v234_v29 }
 0x195   :  { %v3593_v32 = vadd.f32 %v2715_v30, %v240_v31 }
 0x197   :  { %2897 = vmatprep.mubr.msk.f32.mxu0 %vm208_vm1, %v3593_v32 }
 0x198   :  { %v3191_v33 = vpop.eup %3190 }
 0x199   :  { %v235_v34 = vmul.f32 %v3191_v33, %v219_v12 }
 0x19b   :  { %v241_v35 = vmul.f32 %v2714_v28, %v235_v34 }
 0x19d   :  { %v3597_v36 = vadd.f32 %v2715_v30, %v241_v35 }
 0x19f   :  { %2898 = vmatmul.mubr.msk.f32.vlgmr.msra.gmra.mrb[0].mxu0 %vm208_vm1, %v3597_v36 }
 0x1a0   :  { %2922 = vmatprep.mubr.msk.f32.mxu0 %vm3345_vm2, %v3344_v37 }
 0x272   :  { %v2899_v39 = vpop.f32.mrb[0].mxu0 }
 0x273   :  { %v332_v40 = vpop.f32.mrb[1].mxu0  ;;  %v3613_v42 = vadd.f32 %v2899_v39, %v2716_v38 }
 0x274   :  { %v3607_v41 = vadd.f32 %v2716_v38, %v332_v40 }
 0x276   :  { %342 = vrot.lane.b32.xlu0 %v3607_v41, %s3346_s23 }
 0x27a   :  { %516 = vrot.lane.b32.xlu0 %v3607_v41, %s3347_s26 }
 0x27e   :  { %688 = vrot.lane.b32.xlu0 %v3613_v42, %s3346_s23 }
 0x282   :  { %858 = vrot.lane.b32.xlu0 %v3613_v42, %s3348_s24 }
 0x2e8   :  { %v343_v43 = vpop.permute.xlu0 %342 }
 0x2e9   :  { %2901 = vmatpush3.xpose.msk.msra.mxu1 %vm344_vm3, %v343_v43 }
 0x2ea   :  { %2905 = vmatprep.subr.mxu1 %v3344_v37 }
 0x2ec   :  { %2903 = vmatmul.mubr.msk.f32.vlgmr.msra.gmra.mrb[0].mxu1 %vm344_vm3, %v3607_v41  ;;  %v517_v44 = vpop.permute.xlu0 %516 }
 0x2ed   :  { %2907 = vmatprep.mubr.msk.f32.mxu1 %vm3345_vm2, %v3344_v37 }
 0x2f0   :  { %v689_v45 = vpop.permute.xlu0 %688 }
 0x2f1   :  { %2921 = vmatpush3.xpose.msk.msra.mxu0 %vm344_vm3, %v689_v45 }
 0x2f2   :  { %2930 = vmatprep.subr.mxu0 %v3344_v37 }
 0x2f4   :  { %2923 = vmatmul.mubr.msk.f32.vlgmr.msra.gmra.mrb[2].mxu0 %vm344_vm3, %v3613_v42  ;;  %v859_v1 = vpop.permute.xlu0 %858 }
 0x2f5   :  { %2932 = vmatprep.mubr.msk.f32.mxu0 %vm3345_vm2, %v3344_v37 }
 0x3bf   :  { %v415_v53 = vpop.f32.mrb[0].mxu1 }
 0x3c0   :  { %v419_v54 = vmul.f32 0.25, %v415_v53  ;;  %v2904_v55 = vpop.f32.mrb[1].mxu1 }
 0x3c2   :  { %v424_v56 = vadd.f32 %v3634_v52, %v419_v54 }
 0x3c4   :  { %v426_v58 = vsel %vm425_vm4, %v424_v56, -inf }
 0x3c5   :  { %427 = vmax.xlane.f32.xlu1 %v426_v58 }
 0x3c7   :  { %v760_v60 = vpop.f32.mrb[2].mxu0 }
 0x3c8   :  { %v764_v61 = vmul.f32 0.25, %v760_v60  ;;  %v2924_v62 = vpop.f32.mrb[3].mxu0  ;;  %v1034_v60 = vld [vmem:[%s3939_s5 + $0x10] sm:$0xff] }
 0x3ca   :  { %v769_v63 = vadd.f32 %v3638_v59, %v764_v61  ;;  %v1035_v61 = vld [vmem:[%s3939_s5 + $0x18] sm:$0xff] }
 0x3cb   :  { %v3096_v62 = vpack.c.bf16 %v1035_v61, %v1034_v60  ;;  %v1277_v60 = vld [vmem:[%s3941_s7 + $0x28] sm:$0xff] }
 0x3cc   :  { %v770_v0 = vsel %vm425_vm4, %v769_v63, -inf }
 0x3cd   :  { %771 = vmax.xlane.f32.xlu0 %v770_v0 }
 0x3d6   :  { %437 = vrot.lane.b32.xlu1 %v3607_v41, %s3349_s1 }
 0x3da   :  { %514 = vrot.lane.b32.xlu1 %v3607_v41, %s3348_s24 }
 0x452   :  { %v428_v2 = vpop.xlane.xlu1 %427 }
 0x453   :  { %v429_v3 = vsub.f32 %v424_v56, %v428_v2  ;;  %v1032_v56 = vld [vmem:[%s3939_s5] sm:$0xff] }
 0x454   :  { %v3092_v58 = vpack.c.bf16 %v1033_v57, %v1032_v56  ;;  %v1275_v56 = vld [vmem:[%s3941_s7 + $0x18] sm:$0xff] }
 0x455   :  { %v430_v4 = vmul.f32 1.442695, %v429_v3 }
 0x456   :  { %v438_v5 = vpop.permute.xlu1 %437 }
 0x457   :  { %3192 = vpow2.f32 %v430_v4  ;;  %2906 = vmatpush3.msra.mxu1 %v438_v5 }
 0x458   :  { %2910 = vmatprep.subr.mxu1 %v3344_v37 }
 0x45a   :  { %v515_v8 = vpop.permute.xlu1 %514  ;;  %v772_v13 = vpop.xlane.xlu0 %771 }
 0x45b   :  { %v773_v14 = vsub.f32 %v769_v63, %v772_v13 }
 0x45d   :  { %v774_v18 = vmul.f32 1.442695, %v773_v14 }
 0x461   :  { %v3193_v6 = vpop.eup %3192 }
 0x462   :  { %v432_v7 = vsel %vm425_vm4, %v3193_v6, 0.0 }
 0x463   :  { %433 = vadd.xlane.f32.xlu1 %v432_v7 }
 0x474   :  { %860 = vrot.lane.b32.xlu1 %v3613_v42, %s3347_s26 }
 0x4f0   :  { %v434_v9 = vpop.xlane.xlu1 %433 }
 0x4f1   :  { %3194 = vrcp.f32 %v434_v9 }
 0x4f2   :  { %3196 = vpow2.f32 %v774_v18 }
 0x4f4   :  { %v861_v10 = vpop.permute.xlu1 %860 }
 0x4f5   :  { %2931 = vmatpush3.xpose.msk.msra.mxu0 %vm344_vm3, %v861_v10  ;;  %v2731_v10 = vld [vmem:[#allocation8 + $0x1] ss:$0 sm:$0xff] }
 0x4f6   :  { %3093 = vmatprep.subr.bf16.mxu0 %v3092_v58 }
 0x4f8   :  { %2933 = vmatmul.mubr.msk.f32.vlgmr.msra.gmra.mrb[4].mxu0 %vm344_vm3, %v859_v1 }
 0x4f9   :  { %3095 = vmatpush3.bf16.msra.mxu0 %v3092_v58  ;;  %v1276_v58 = vld [vmem:[%s3941_s7 + $0x20] sm:$0xff] }
 0x4fa   :  { %3097 = vmatprep.subr.bf16.mxu0 %v3096_v62  ;;  %v3116_v61 = vpack.c.bf16 %v1277_v60, %v1276_v58  ;;  %v2742_v58 = vld [vmem:[#allocation8 + $0x6] ss:$0 sm:$0xff] }
 0x4fb   :  { %v3195_v11 = vpop.eup %3194 }
 0x4fc   :  { %v436_v12 = vmul.f32 %v3195_v11, %v3193_v6  ;;  %v3197_v28 = vpop.eup %3196 }
 0x4fd   :  { %v776_v29 = vsel %vm425_vm4, %v3197_v28, 0.0  ;;  %3099 = vmatpush3.bf16.msra.mxu0 %v3096_v62  ;;  %v1278_v62 = vld [vmem:[%s3941_s7 + $0x30] sm:$0xff] }
 0x4fe   :  { %2908 = vmatmul.mubr.msk.f32.vlgmr.msra.gmra.mrb[2].mxu1 %vm425_vm4, %v436_v12 }
 0x4ff   :  { %2911 = vmatpush3.xpose.msk.msra.mxu1 %vm344_vm3, %v517_v44  ;;  %2912 = vmatprep.mubr.msk.f32.mxu1 %vm3345_vm2, %v3344_v37 }
 0x500   :  { %2915 = vmatprep.subr.mxu1 %v3344_v37 }
 0x502   :  { %2913 = vmatmul.mubr.msk.f32.vlgmr.msra.gmra.mrb[4].mxu1 %vm344_vm3, %v515_v8 }
 0x503   :  { %2917 = vmatprep.mubr.msk.f32.mxu1 %vm3345_vm2, %v3344_v37 }
 0x5cb   :  { %v932_v15 = vpop.f32.mrb[4].mxu0 }
 0x5cc   :  { %v936_v16 = vmul.f32 0.25, %v932_v15  ;;  %v2934_v17 = vpop.f32.mrb[5].mxu0 }
 0x5ce   :  { %v937_v19 = vadd.f32 %v936_v16, %v3638_v59 }
 0x5d0   :  { %v938_v20 = vsel %vm425_vm4, %v937_v19, -inf }
 0x5d1   :  { %v509_v21 = vpop.f32.mrb[2].mxu1  ;;  %939 = vmax.xlane.f32.xlu0 %v938_v20 }
 0x5d2   :  { %513 = vst.msk [vmem:[#allocation3] sm:$0xff] %vm344_vm3, %v509_v21  ;;  %v2909_v22 = vpop.f32.mrb[3].mxu1 }
 0x5d5   :  { %v588_v23 = vpop.f32.mrb[4].mxu1 }
 0x5d6   :  { %v592_v24 = vmul.f32 0.25, %v588_v23  ;;  %v2914_v25 = vpop.f32.mrb[5].mxu1 }
 0x5d8   :  { %v593_v26 = vadd.f32 %v592_v24, %v3634_v52 }
 0x5da   :  { %v594_v27 = vsel %vm425_vm4, %v593_v26, -inf }
 0x5db   :  { %595 = vmax.xlane.f32.xlu1 %v594_v27  ;;  %v1165_v27 = vld [vmem:[%s3940_s6 + $0x8] sm:$0xff] }
 0x5df   :  { %777 = vadd.xlane.f32.xlu1 %v776_v29  ;;  %v1166_v29 = vld [vmem:[%s3940_s6 + $0x10] sm:$0xff] }
 0x5f0   :  { %605 = vrot.lane.b32.xlu1 %v3607_v41, %s3350_s28 }
 0x5f4   :  { %949 = vrot.lane.b32.xlu1 %v3613_v42, %s3350_s28 }
 0x65e   :  { %v940_v30 = vpop.xlane.xlu0 %939 }
 0x65f   :  { %v941_v31 = vsub.f32 %v937_v19, %v940_v30  ;;  %v1167_v30 = vld [vmem:[%s3940_s6 + $0x18] sm:$0xff] }
 0x661   :  { %v942_v33 = vmul.f32 1.442695, %v941_v31  ;;  %v3104_v31 = vpack.c.bf16 %v1167_v30, %v1166_v29 }
 0x663   :  { %3198 = vpow2.f32 %v942_v33 }
 0x668   :  { %v596_v34 = vpop.xlane.xlu1 %595 }
 0x669   :  { %v597_v35 = vsub.f32 %v593_v26, %v596_v34 }
 0x66b   :  { %v598_v38 = vmul.f32 1.442695, %v597_v35 }
 0x66c   :  { %v778_v39 = vpop.xlane.xlu1 %777 }
 0x66d   :  { %v3199_v40 = vpop.eup %3198  ;;  %3200 = vpow2.f32 %v598_v38 }
 0x66e   :  { %v944_v43 = vsel %vm425_vm4, %v3199_v40, 0.0 }
 0x66f   :  { %945 = vadd.xlane.f32.xlu0 %v944_v43 }
 0x670   :  { %v606_v44 = vpop.permute.xlu1 %605 }
 0x671   :  { %2916 = vmatpush3.msra.mxu1 %v606_v44  ;;  %v2734_v44 = vld [vmem:[#allocation8 + $0x2] ss:$0 sm:$0xff] }
 0x672   :  { %2925 = vmatprep.subr.mxu1 %v3344_v37 }
 0x677   :  { %v3201_v41 = vpop.eup %3200 }
 0x678   :  { %v600_v45 = vsel %vm425_vm4, %v3201_v41, 0.0 }
 0x679   :  { %601 = vadd.xlane.f32.xlu0 %v600_v45  ;;  %v2735_v45 = vld [vmem:[#allocation8 + $0x3] ss:$0 sm:$0xff] }
 0x68f   :  { %781 = vrot.lane.b32.xlu0 %v3613_v42, %s3349_s1  ;;  %v950_v42 = vpop.permute.xlu1 %949 }
 0x6fc   :  { %v946_v46 = vpop.xlane.xlu0 %945 }
 0x706   :  { %v602_v47 = vpop.xlane.xlu0 %601 }
 0x707   :  { %3202 = vrcp.f32 %v602_v47 }
 0x708   :  { %3204 = vrcp.f32 %v778_v39 }
 0x709   :  { %3206 = vrcp.f32 %v946_v46 }
 0x70a   :  { %v782_v51 = vpop.permute.xlu0 %781 }
 0x711   :  { %v3203_v48 = vpop.eup %3202 }
 0x712   :  { %v604_v49 = vmul.f32 %v3203_v48, %v3201_v41  ;;  %v3205_v50 = vpop.eup %3204 }
 0x713   :  { %v780_v53 = vmul.f32 %v3205_v50, %v3197_v28  ;;  %v3207_v54 = vpop.eup %3206 }
 0x714   :  { %2918 = vmatmul.mubr.msk.f32.vlgmr.msra.gmra.mrb[6].mxu1 %vm425_vm4, %v604_v49  ;;  %v948_v55 = vmul.f32 %v3207_v54, %v3199_v40  ;;  %v1273_v54 = vld [vmem:[%s3941_s7 + $0x8] sm:$0xff] }
 0x715   :  { %2926 = vmatpush3.msra.mxu1 %v782_v51  ;;  %2927 = vmatprep.mubr.msk.f32.mxu1 %vm3345_vm2, %v3344_v37 }
 0x716   :  { %2935 = vmatprep.subr.mxu1 %v3344_v37 }
 0x718   :  { %2928 = vmatmul.mubr.msk.f32.vlgmr.msra.gmra.mrb[8].mxu1 %vm425_vm4, %v780_v53  ;;  %v1272_v53 = vld [vmem:[%s3941_s7] sm:$0xff] }
 0x719   :  { %2936 = vmatpush3.msra.mxu1 %v950_v42  ;;  %2937 = vmatprep.mubr.msk.f32.mxu1 %vm3345_vm2, %v3344_v37  ;;  %v3108_v42 = vpack.c.bf16 %v1273_v54, %v1272_v53 }
 0x71b   :  { %3109 = vmatprep.subr.bf16.mxu0 %v3108_v42 }
 0x71c   :  { %2938 = vmatmul.mubr.msk.f32.vlgmr.msra.gmra.mrb[10].mxu1 %vm425_vm4, %v948_v55  ;;  %v1274_v55 = vld [vmem:[%s3941_s7 + $0x10] sm:$0xff] }
 0x71d   :  { %v3112_v57 = vpack.c.bf16 %v1275_v56, %v1274_v55 }
 0x7e7   :  { %v677_v63 = vpop.f32.mrb[6].mxu1 }
 0x7e8   :  { %682 = vrot.lane.b32.xlu1 %v677_v63, %s3351_s18  ;;  %v2919_v0 = vpop.f32.mrb[7].mxu1  ;;  %v1279_v63 = vld [vmem:[%s3941_s7 + $0x38] sm:$0xff] }
 0x7e9   :  { %v3120_v0 = vpack.c.bf16 %v1279_v63, %v1278_v62  ;;  %v2743_v63 = vld [vmem:[#allocation8 + $0x7] ss:$0 sm:$0xff] }
 0x7eb   :  { %v853_v2 = vpop.f32.mrb[8].mxu1 }
 0x7ec   :  { %857 = vst.msk [vmem:[#allocation3 + $0x8] sm:$0xff] %vm344_vm3, %v853_v2  ;;  %v2929_v3 = vpop.f32.mrb[9].mxu1  ;;  %v2736_v2 = vld [vmem:[#allocation8 + $0x4] ss:$0 sm:$0xff] }
 0x7ef   :  { %v1021_v4 = vpop.f32.mrb[10].mxu1 }
 0x7f0   :  { %1026 = vrot.lane.b32.xlu1 %v1021_v4, %s3351_s18  ;;  %v2939_v5 = vpop.f32.mrb[11].mxu1 }
 0x85a   :  { %v683_v6 = vpop.permute.xlu1 %682 }
 0x85b   :  { %686 = vst.msk [vmem:[#allocation3] sm:$0xff] %vm685_vm5, %v683_v6 }
 0x862   :  { %v1027_v7 = vpop.permute.xlu1 %1026  ;;  %v1030_v8 = vld [vmem:[#allocation3] sm:$0xff] }
 0x863   :  { %1029 = vst.msk [vmem:[#allocation3 + $0x8] sm:$0xff] %vm685_vm5, %v1027_v7  ;;  %2948 = vmatprep.mubr.msk.f32.mxu0 %vm208_vm1, %v1030_v8 }
 0x86a   :  { %v1031_v9 = vld [vmem:[#allocation3 + $0x8] sm:$0xff] }
 0x86b   :  { %2949 = vmatmul.mubr.msk.f32.vlgmr.msra.gmra.mrb[6].mxu0 %vm208_vm1, %v1031_v9 }
 0x86c   :  { %3111 = vmatpush3.bf16.msra.mxu0 %v3108_v42 }
 0x86d   :  { %3113 = vmatprep.subr.bf16.mxu0 %v3112_v57 }
 0x870   :  { %3115 = vmatpush3.bf16.msra.mxu0 %v3112_v57 }
 0x871   :  { %3117 = vmatprep.subr.bf16.mxu0 %v3116_v61 }
 0x874   :  { %3119 = vmatpush3.bf16.msra.mxu0 %v3116_v61 }
 0x875   :  { %3121 = vmatprep.subr.bf16.mxu0 %v3120_v0 }
 0x878   :  { %3123 = vmatpush3.bf16.msra.mxu0 %v3120_v0 }
 0x879   :  { %3002 = vmatprep.subr.mxu0 %v3344_v37 }
 0x93e   :  { %v2950_v1 = vpop.f32.mrb[6].mxu0 }
 0x93f   :  { %v1119_v11 = vadd.f32 %v2950_v1, %v2731_v10  ;;  %v1113_v12 = vpop.f32.mrb[7].mxu0 }
 0x940   :  { %v1114_v13 = vadd.f32 %v2731_v10, %v1113_v12 }
 0x941   :  { %v1123_v14 = vadd.f32 %v1119_v11, %v3597_v36 }
 0x942   :  { %v1122_v15 = vadd.f32 %v1114_v13, %v3593_v32  ;;  %v1164_v32 = vld [vmem:[%s3940_s6] sm:$0xff] }
 0x943   :  { %v1129_v16 = vsel %vm208_vm1, %v1123_v14, 0.0  ;;  %v3100_v28 = vpack.c.bf16 %v1165_v27, %v1164_v32 }
 0x944   :  { %1130 = vadd.xlane.f32.xlu1 %v1129_v16  ;;  %v1126_v17 = vsel %vm208_vm1, %v1122_v15, 0.0 }
 0x945   :  { %1127 = vadd.xlane.f32.xlu0 %v1126_v17  ;;  %3101 = vmatprep.subr.bf16.mxu1 %v3100_v28 }
 0x946   :  { %3103 = vmatpush3.bf16.msra.mxu1 %v3100_v28 }
 0x947   :  { %3105 = vmatprep.subr.bf16.mxu1 %v3104_v31 }
 0x94a   :  { %3107 = vmatpush3.bf16.msra.mxu1 %v3104_v31 }
 0x9d1   :  { %v1131_v18 = vpop.xlane.xlu1 %1130 }
 0x9d2   :  { %v1133_v19 = vmul.f32 0.03125, %v1131_v18  ;;  %v1128_v20 = vpop.xlane.xlu0 %1127 }
 0x9d3   :  { %v1132_v21 = vmul.f32 0.03125, %v1128_v20 }
 0x9d4   :  { %v1135_v22 = vsub.f32 %v1123_v14, %v1133_v19 }
 0x9d5   :  { %v1134_v23 = vsub.f32 %v1122_v15, %v1132_v21 }
 0x9d6   :  { %v1137_v26 = vmul.f32 %v1135_v22, %v1135_v22 }
 0x9d7   :  { %v1136_v24 = vmul.f32 %v1134_v23, %v1134_v23 }
 0x9d8   :  { %v1141_v36 = vsel %vm208_vm1, %v1137_v26, 0.0 }
 0x9d9   :  { %v1138_v25 = vsel %vm208_vm1, %v1136_v24, 0.0  ;;  %v2739_v24 = vld [vmem:[#allocation8 + $0x5] ss:$0 sm:$0xff] }
 0x9da   :  { %1139 = vadd.xlane.f32.xlu0 %v1138_v25 }
 0x9de   :  { %1142 = vadd.xlane.f32.xlu0 %v1141_v36 }
 0xa67   :  { %v1140_v33 = vpop.xlane.xlu0 %1139 }
 0xa68   :  { %v1144_v34 = vmul.f32 0.03125, %v1140_v33 }
 0xa6a   :  { %v1146_v35 = vadd.f32 1e-12, %v1144_v34 }
 0xa6b   :  { %v1143_v38 = vpop.xlane.xlu0 %1142 }
 0xa6c   :  { %3208 = vrsqrt.f32 %v1146_v35  ;;  %v1145_v39 = vmul.f32 0.03125, %v1143_v38 }
 0xa6e   :  { %v1147_v40 = vadd.f32 1e-12, %v1145_v39 }
 0xa70   :  { %3210 = vrsqrt.f32 %v1147_v40 }
 0xa76   :  { %v3209_v43 = vpop.eup %3208 }
 0xa77   :  { %v1150_v41 = vmul.f32 %v3209_v43, %v1134_v23 }
 0xa79   :  { %v1156_v46 = vmul.f32 %v2734_v44, %v1150_v41 }
 0xa7a   :  { %v3211_v47 = vpop.eup %3210 }
 0xa7b   :  { %v1151_v48 = vmul.f32 %v3211_v47, %v1135_v22  ;;  %v1162_v49 = vadd.f32 %v2735_v45, %v1156_v46  ;;  %v2745_v46 = vld [vmem:[%s3938_s4 + $0x28] sm:$0xff] }
 0xa7d   :  { %v1157_v50 = vmul.f32 %v2734_v44, %v1151_v48  ;;  %2959 = vmatprep.mubr.msk.f32.mxu1 %vm208_vm1, %v1162_v49  ;;  %v2746_v48 = vld [vmem:[%s3938_s4 + $0x30] sm:$0xff] }
 0xa7f   :  { %v1163_v51 = vadd.f32 %v2735_v45, %v1157_v50  ;;  %v2744_v45 = vld [vmem:[%s3938_s4 + $0x20] sm:$0xff] }
 0xa80   :  { %v3124_v47 = vpack.c.bf16 %v2745_v46, %v2744_v45 }
 0xa81   :  { %2960 = vmatmul.mubr.msk.f32.vlgmr.msra.gmra.mrb[12].mxu1 %vm208_vm1, %v1163_v51 }
 0xa82   :  { %3125 = vmatprep.subr.bf16.mxu1 %v3124_v47 }
 0xa83   :  { %3127 = vmatpush3.bf16.msra.mxu1 %v3124_v47 }
 0xb54   :  { %v2961_v3 = vpop.f32.mrb[12].mxu1 }
 0xb55   :  { %v1251_v4 = vadd.f32 %v2961_v3, %v2736_v2  ;;  %v1245_v5 = vpop.f32.mrb[13].mxu1 }
 0xb56   :  { %v1246_v6 = vadd.f32 %v2736_v2, %v1245_v5  ;;  %v2748_v5 = vld [vmem:[#allocation8 + $0x8] ss:$0 sm:$0xff] }
 0xb57   :  { %v1257_v7 = vmul.f32 0.044715, %v1251_v4  ;;  %v1255_v21 = vmul.f32 0.5, %v1251_v4 }
 0xb58   :  { %v1256_v8 = vmul.f32 0.044715, %v1246_v6  ;;  %v1254_v19 = vmul.f32 0.5, %v1246_v6 }
 0xb59   :  { %v1259_v9 = vmul.f32 %v1257_v7, %v1251_v4 }
 0xb5a   :  { %v1258_v10 = vmul.f32 %v1256_v8, %v1246_v6 }
 0xb5b   :  { %v1261_v1 = vmul.f32 %v1259_v9, %v1251_v4 }
 0xb5c   :  { %v1260_v11 = vmul.f32 %v1258_v10, %v1246_v6 }
 0xb5d   :  { %v1263_v12 = vadd.f32 %v1261_v1, %v1251_v4 }
 0xb5e   :  { %v1262_v13 = vadd.f32 %v1260_v11, %v1246_v6 }
 0xb5f   :  { %v1265_v14 = vmul.f32 0.7978846, %v1263_v12 }
 0xb60   :  { %v1264_v15 = vmul.f32 0.7978846, %v1262_v13 }
 0xb61   :  { %3212 = vtanh.f32 %v1265_v14 }
 0xb62   :  { %3214 = vtanh.f32 %v1264_v15 }
 0xb6b   :  { %v3213_v16 = vpop.eup %3212 }
 0xb6c   :  { %v3215_v17 = vpop.eup %3214  ;;  %v1269_v18 = vadd.f32 1.0, %v3213_v16 }
 0xb6d   :  { %v1268_v20 = vadd.f32 1.0, %v3215_v17 }
 0xb6e   :  { %v1271_v23 = vmul.f32 %v1269_v18, %v1255_v21 }
 0xb6f   :  { %v1270_v22 = vmul.f32 %v1268_v20, %v1254_v19 }
 0xb71   :  { %2978 = vmatprep.mubr.msk.f32.mxu0 %vm1285_vm6, %v1270_v22 }
 0xb72   :  { %2979 = vmatmul.mubr.msk.f32.vlgmr.msra.gmra.mrb[8].mxu0 %vm1285_vm6, %v1271_v23 }
 0xb73   :  { %3004 = vmatprep.mubr.msk.f32.mxu0 %vm3345_vm2, %v3344_v37 }
 0xc45   :  { %v2980_v25 = vpop.f32.mrb[8].mxu0 }
 0xc46   :  { %v1364_v26 = vadd.f32 %v2980_v25, %v2739_v24  ;;  %v1358_v36 = vpop.f32.mrb[9].mxu0 }
 0xc47   :  { %v1359_v32 = vadd.f32 %v2739_v24, %v1358_v36 }
 0xc48   :  { %v1368_v27 = vadd.f32 %v1364_v26, %v1163_v51 }
 0xc49   :  { %v1367_v28 = vadd.f32 %v1359_v32, %v1162_v49  ;;  %v2747_v49 = vld [vmem:[%s3938_s4 + $0x38] sm:$0xff] }
 0xc4a   :  { %v1374_v29 = vsel %vm208_vm1, %v1368_v27, 0.0  ;;  %v3128_v50 = vpack.c.bf16 %v2747_v49, %v2746_v48 }
 0xc4b   :  { %1375 = vadd.xlane.f32.xlu1 %v1374_v29  ;;  %v1371_v30 = vsel %vm208_vm1, %v1367_v28, 0.0 }
 0xc4c   :  { %1372 = vadd.xlane.f32.xlu0 %v1371_v30  ;;  %3129 = vmatprep.subr.bf16.mxu1 %v3128_v50 }
 0xc4d   :  { %3131 = vmatpush3.bf16.msra.mxu1 %v3128_v50 }
 0xc4e   :  { %2992 = vmatprep.subr.mxu1 %v3344_v37 }
 0xcd8   :  { %v1376_v31 = vpop.xlane.xlu1 %1375 }
 0xcd9   :  { %v1378_v33 = vmul.f32 0.03125, %v1376_v31  ;;  %v1373_v34 = vpop.xlane.xlu0 %1372 }
 0xcda   :  { %v1377_v35 = vmul.f32 0.03125, %v1373_v34 }
 0xcdb   :  { %v1380_v38 = vsub.f32 %v1368_v27, %v1378_v33 }
 0xcdc   :  { %v1379_v39 = vsub.f32 %v1367_v28, %v1377_v35 }
 0xcdd   :  { %v1382_v40 = vmul.f32 %v1380_v38, %v1380_v38 }
 0xcde   :  { %v1381_v43 = vmul.f32 %v1379_v39, %v1379_v39 }
 0xcdf   :  { %v1386_v44 = vsel %vm208_vm1, %v1382_v40, 0.0 }
 0xce0   :  { %1387 = vadd.xlane.f32.xlu1 %v1386_v44  ;;  %v1383_v41 = vsel %vm208_vm1, %v1381_v43, 0.0 }
 0xce1   :  { %1384 = vadd.xlane.f32.xlu0 %v1383_v41 }
 0xd6d   :  { %v1388_v51 = vpop.xlane.xlu1 %1387 }
 0xd6e   :  { %v1390_v53 = vmul.f32 0.03125, %v1388_v51  ;;  %v1385_v54 = vpop.xlane.xlu0 %1384 }
 0xd6f   :  { %v1389_v42 = vmul.f32 0.03125, %v1385_v54 }
 0xd70   :  { %v1392_v55 = vadd.f32 1e-12, %v1390_v53 }
 0xd71   :  { %v1391_v56 = vadd.f32 1e-12, %v1389_v42 }
 0xd72   :  { %3216 = vrsqrt.f32 %v1392_v55 }
 0xd73   :  { %3218 = vrsqrt.f32 %v1391_v56 }
 0xd7c   :  { %v3217_v57 = vpop.eup %3216 }
 0xd7d   :  { %v3219_v60 = vpop.eup %3218  ;;  %v1396_v61 = vmul.f32 %v3217_v57, %v1380_v38 }
 0xd7e   :  { %v1395_v62 = vmul.f32 %v3219_v60, %v1379_v39 }
 0xd7f   :  { %v1402_v0 = vmul.f32 %v2742_v58, %v1396_v61 }
 0xd80   :  { %v1401_v2 = vmul.f32 %v2742_v58, %v1395_v62 }
 0xd81   :  { %v3770_v4 = vadd.f32 %v2743_v63, %v1402_v0 }
 0xd82   :  { %v3768_v3 = vadd.f32 %v2743_v63, %v1401_v2 }
 0xd84   :  { %2989 = vmatprep.mubr.msk.f32.mxu1 %vm208_vm1, %v3768_v3 }
 0xd85   :  { %2990 = vmatmul.mubr.msk.f32.vlgmr.msra.gmra.mrb[14].mxu1 %vm208_vm1, %v3770_v4 }
 0xd86   :  { %2994 = vmatprep.mubr.msk.f32.mxu1 %vm3345_vm2, %v3344_v37 }
 0xe58   :  { %v2991_v6 = vpop.f32.mrb[14].mxu1 }
 0xe59   :  { %v1492_v7 = vpop.f32.mrb[15].mxu1  ;;  %v3784_v9 = vadd.f32 %v2991_v6, %v2748_v5 }
 0xe5a   :  { %v3778_v8 = vadd.f32 %v2748_v5, %v1492_v7 }
 0xe5c   :  { %1670 = vrot.lane.b32.xlu1 %v3778_v8, %s3347_s26  ;;  %1502 = vrot.lane.b32.xlu0 %v3778_v8, %s3346_s23 }
 0xe60   :  { %1668 = vrot.lane.b32.xlu1 %v3778_v8, %s3348_s24  ;;  %2009 = vrot.lane.b32.xlu0 %v3784_v9, %s3347_s26 }
 0xe64   :  { %1841 = vrot.lane.b32.xlu1 %v3784_v9, %s3346_s23 }
 0xe68   :  { %2007 = vrot.lane.b32.xlu1 %v3784_v9, %s3348_s24 }
 0xece   :  { %v1671_v10 = vpop.permute.xlu1 %1670  ;;  %v1503_v1 = vpop.permute.xlu0 %1502 }
 0xecf   :  { %2993 = vmatpush3.xpose.msk.msra.mxu1 %vm344_vm3, %v1503_v1  ;;  %3003 = vmatpush3.xpose.msk.msra.mxu0 %vm344_vm3, %v1671_v10 }
 0xed0   :  { %3012 = vmatprep.subr.mxu0 %v3344_v37  ;;  %2997 = vmatprep.subr.mxu1 %v3344_v37 }
 0xed2   :  { %v1669_v11 = vpop.permute.xlu1 %1668  ;;  %2995 = vmatmul.mubr.msk.f32.vlgmr.msra.gmra.mrb[16].mxu1 %vm344_vm3, %v3778_v8  ;;  %v2010_v13 = vpop.permute.xlu0 %2009 }
 0xed3   :  { %3005 = vmatmul.mubr.msk.f32.vlgmr.msra.gmra.mrb[10].mxu0 %vm344_vm3, %v1669_v11  ;;  %2999 = vmatprep.mubr.msk.f32.mxu1 %vm3345_vm2, %v3344_v37 }
 0xed4   :  { %3014 = vmatprep.mubr.msk.f32.mxu0 %vm3345_vm2, %v3344_v37 }
 0xed6   :  { %v1842_v12 = vpop.permute.xlu1 %1841 }
 0xed7   :  { %3013 = vmatpush3.xpose.msk.msra.mxu0 %vm344_vm3, %v1842_v12 }
 0xed8   :  { %3022 = vmatprep.subr.mxu0 %v3344_v37 }
 0xeda   :  { %3015 = vmatmul.mubr.msk.f32.vlgmr.msra.gmra.mrb[12].mxu0 %vm344_vm3, %v3784_v9  ;;  %v2008_v14 = vpop.permute.xlu1 %2007 }
 0xedb   :  { %3023 = vmatpush3.xpose.msk.msra.mxu0 %vm344_vm3, %v2010_v13  ;;  %3024 = vmatprep.mubr.msk.f32.mxu0 %vm3345_vm2, %v3344_v37 }
 0xede   :  { %3025 = vmatmul.mubr.msk.f32.vlgmr.msra.gmra.mrb[14].mxu0 %vm344_vm3, %v2008_v14 }
 0xfa5   :  { %v1574_v15 = vpop.f32.mrb[16].mxu1 }
 0xfa6   :  { %v1578_v16 = vmul.f32 0.25, %v1574_v15  ;;  %v2996_v17 = vpop.f32.mrb[17].mxu1  ;;  %v1742_v18 = vpop.f32.mrb[10].mxu0 }
 0xfa7   :  { %v1746_v19 = vmul.f32 0.25, %v1742_v18  ;;  %v3006_v20 = vpop.f32.mrb[11].mxu0  ;;  %v2764_v17 = vld [vmem:[%s3939_s5 + $0x28] sm:$0xff] }
 0xfa8   :  { %v1579_v21 = vadd.f32 %v1578_v16, %v3634_v52  ;;  %v2763_v16 = vld [vmem:[%s3939_s5 + $0x20] sm:$0xff]  ;;  %v2766_v20 = vld [vmem:[%s3939_s5 + $0x38] sm:$0xff] }
 0xfa9   :  { %v1747_v22 = vadd.f32 %v1746_v19, %v3634_v52  ;;  %v3132_v18 = vpack.c.bf16 %v2764_v17, %v2763_v16  ;;  %v2765_v19 = vld [vmem:[%s3939_s5 + $0x30] sm:$0xff]  ;;  %v2776_v17 = vld [vmem:[#allocation8 + $0xc] ss:$0 sm:$0xff] }
 0xfaa   :  { %v1580_v23 = vsel %vm425_vm4, %v1579_v21, -inf }
 0xfab   :  { %1581 = vmax.xlane.f32.xlu0 %v1580_v23  ;;  %v1748_v24 = vsel %vm425_vm4, %v1747_v22, -inf  ;;  %3133 = vmatprep.subr.bf16.mxu0 %v3132_v18 }
 0xfac   :  { %1749 = vmax.xlane.f32.xlu1 %v1748_v24  ;;  %3135 = vmatpush3.bf16.msra.mxu0 %v3132_v18 }
 0xfad   :  { %v1913_v25 = vpop.f32.mrb[12].mxu0 }
 0xfae   :  { %v1917_v26 = vmul.f32 0.25, %v1913_v25  ;;  %v3016_v36 = vpop.f32.mrb[13].mxu0 }
 0xfb0   :  { %v1918_v32 = vadd.f32 %v1917_v26, %v3638_v59 }
 0xfb1   :  { %v2081_v27 = vpop.f32.mrb[14].mxu0 }
 0xfb2   :  { %v2085_v28 = vmul.f32 0.25, %v2081_v27  ;;  %v3026_v29 = vpop.f32.mrb[15].mxu0  ;;  %v1919_v30 = vsel %vm425_vm4, %v1918_v32, -inf }
 0xfb3   :  { %1920 = vmax.xlane.f32.xlu0 %v1919_v30 }
 0xfb4   :  { %v2086_v31 = vadd.f32 %v2085_v28, %v3638_v59 }
 0xfb6   :  { %v2087_v52 = vsel %vm425_vm4, %v2086_v31, -inf }
 0xfb7   :  { %2088 = vmax.xlane.f32.xlu0 %v2087_v52 }
0x1038   :  { %v1582_v33 = vpop.xlane.xlu0 %1581 }
0x1039   :  { %v1583_v34 = vsub.f32 %v1579_v21, %v1582_v33  ;;  %v1750_v35 = vpop.xlane.xlu1 %1749  ;;  %v3136_v21 = vpack.c.bf16 %v2766_v20, %v2765_v19 }
0x103a   :  { %v1751_v38 = vsub.f32 %v1747_v22, %v1750_v35 }
0x103b   :  { %v1584_v39 = vmul.f32 1.442695, %v1583_v34  ;;  %3137 = vmatprep.subr.bf16.mxu0 %v3136_v21 }
0x103c   :  { %v1752_v40 = vmul.f32 1.442695, %v1751_v38  ;;  %3139 = vmatpush3.bf16.msra.mxu0 %v3136_v21 }
0x103d   :  { %3220 = vpow2.f32 %v1584_v39 }
0x103e   :  { %3222 = vpow2.f32 %v1752_v40 }
0x1040   :  { %v1921_v43 = vpop.xlane.xlu0 %1920 }
0x1041   :  { %v1922_v44 = vsub.f32 %v1918_v32, %v1921_v43  ;;  %v2767_v32 = vld [vmem:[#allocation8 + $0x9] ss:$0 sm:$0xff] }
0x1043   :  { %v1923_v41 = vmul.f32 1.442695, %v1922_v44 }
0x1044   :  { %v2089_v50 = vpop.xlane.xlu0 %2088 }
0x1045   :  { %3224 = vpow2.f32 %v1923_v41  ;;  %v2090_v51 = vsub.f32 %v2086_v31, %v2089_v50 }
0x1047   :  { %v3221_v45 = vpop.eup %3220  ;;  %v2091_v53 = vmul.f32 1.442695, %v2090_v51 }
0x1048   :  { %v3223_v46 = vpop.eup %3222  ;;  %v1586_v47 = vsel %vm425_vm4, %v3221_v45, 0.0 }
0x1049   :  { %1587 = vadd.xlane.f32.xlu0 %v1586_v47  ;;  %v1754_v59 = vsel %vm425_vm4, %v3223_v46, 0.0  ;;  %3226 = vpow2.f32 %v2091_v53  ;;  %v2773_v47 = vld [vmem:[%s3940_s6 + $0x28] sm:$0xff] }
0x104a   :  { %1755 = vadd.xlane.f32.xlu1 %v1754_v59 }
0x104f   :  { %v3225_v48 = vpop.eup %3224 }
0x1050   :  { %v1925_v49 = vsel %vm425_vm4, %v3225_v48, 0.0 }
0x1051   :  { %1926 = vadd.xlane.f32.xlu0 %v1925_v49  ;;  %v2775_v49 = vld [vmem:[%s3940_s6 + $0x38] sm:$0xff] }
0x1053   :  { %v3227_v54 = vpop.eup %3226 }
0x1054   :  { %v2093_v42 = vsel %vm425_vm4, %v3227_v54, 0.0 }
0x105b   :  { %1759 = vrot.lane.b32.xlu1 %v3778_v8, %s3350_s28 }
0x105f   :  { %1930 = vrot.lane.b32.xlu1 %v3784_v9, %s3349_s1 }
0x1067   :  { %1591 = vrot.lane.b32.xlu0 %v3778_v8, %s3349_s1 }
0x1083   :  { %2094 = vadd.xlane.f32.xlu1 %v2093_v42 }
0x1094   :  { %2098 = vrot.lane.b32.xlu1 %v3784_v9, %s3350_s28 }
0x10d6   :  { %v1588_v55 = vpop.xlane.xlu0 %1587 }
0x10d7   :  { %3228 = vrcp.f32 %v1588_v55  ;;  %v1756_v56 = vpop.xlane.xlu1 %1755 }
0x10d8   :  { %3230 = vrcp.f32 %v1756_v56 }
0x10db   :  { %v1760_v61 = vpop.permute.xlu1 %1759 }
0x10de   :  { %v1927_v57 = vpop.xlane.xlu0 %1926 }
0x10df   :  { %3232 = vrcp.f32 %v1927_v57  ;;  %v1931_v2 = vpop.permute.xlu1 %1930 }
0x10e1   :  { %v3229_v58 = vpop.eup %3228 }
0x10e2   :  { %v1590_v60 = vmul.f32 %v3229_v58, %v3221_v45  ;;  %v1592_v62 = vpop.permute.xlu0 %1591  ;;  %v3231_v63 = vpop.eup %3230  ;;  %v2770_v58 = vld [vmem:[#allocation8 + $0xa] ss:$0 sm:$0xff] }
0x10e3   :  { %2998 = vmatpush3.msra.mxu1 %v1592_v62  ;;  %v1758_v0 = vmul.f32 %v3231_v63, %v3223_v46 }
0x10e4   :  { %3000 = vmatmul.mubr.msk.f32.vlgmr.msra.gmra.mrb[18].mxu1 %vm425_vm4, %v1590_v60  ;;  %3007 = vmatprep.subr.mxu1 %v3344_v37 }
0x10e5   :  { %3008 = vmatpush3.msra.mxu1 %v1760_v61  ;;  %3009 = vmatprep.mubr.msk.f32.mxu1 %vm3345_vm2, %v3344_v37  ;;  %v2771_v61 = vld [vmem:[#allocation8 + $0xb] ss:$0 sm:$0xff] }
0x10e6   :  { %3017 = vmatprep.subr.mxu1 %v3344_v37 }
0x10e8   :  { %3010 = vmatmul.mubr.msk.f32.vlgmr.msra.gmra.mrb[20].mxu1 %vm425_vm4, %v1758_v0 }
0x10e9   :  { %v3233_v5 = vpop.eup %3232  ;;  %3018 = vmatpush3.msra.mxu1 %v1931_v2  ;;  %3019 = vmatprep.mubr.msk.f32.mxu1 %vm3345_vm2, %v3344_v37 }
0x10ea   :  { %v1929_v6 = vmul.f32 %v3233_v5, %v3225_v48  ;;  %3027 = vmatprep.subr.mxu1 %v3344_v37  ;;  %v2774_v48 = vld [vmem:[%s3940_s6 + $0x30] sm:$0xff] }
0x10eb   :  { %v3144_v50 = vpack.c.bf16 %v2775_v49, %v2774_v48 }
0x10ec   :  { %3020 = vmatmul.mubr.msk.f32.vlgmr.msra.gmra.mrb[22].mxu1 %vm425_vm4, %v1929_v6 }
0x10ed   :  { %3029 = vmatprep.mubr.msk.f32.mxu1 %vm3345_vm2, %v3344_v37 }
0x1110   :  { %v2095_v7 = vpop.xlane.xlu1 %2094 }
0x1111   :  { %3234 = vrcp.f32 %v2095_v7  ;;  %v2779_v7 = vld [vmem:[%s3941_s7 + $0x40] sm:$0xff] }
0x1114   :  { %v2099_v8 = vpop.permute.xlu1 %2098 }
0x1115   :  { %3028 = vmatpush3.msra.mxu1 %v2099_v8  ;;  %v2780_v8 = vld [vmem:[%s3941_s7 + $0x48] sm:$0xff] }
0x111b   :  { %v3235_v9 = vpop.eup %3234 }
0x111c   :  { %v2097_v10 = vmul.f32 %v3235_v9, %v3227_v54  ;;  %v3148_v9 = vpack.c.bf16 %v2780_v8, %v2779_v7 }
0x111e   :  { %3030 = vmatmul.mubr.msk.f32.vlgmr.msra.gmra.mrb[24].mxu1 %vm425_vm4, %v2097_v10  ;;  %v2781_v10 = vld [vmem:[%s3941_s7 + $0x50] sm:$0xff]  ;;  %3149 = vmatprep.subr.bf16.mxu0 %v3148_v9 }
0x11b7   :  { %v1663_v1 = vpop.f32.mrb[18].mxu1 }
0x11b8   :  { %1667 = vst.msk [vmem:[#allocation3] sm:$0xff] %vm344_vm3, %v1663_v1  ;;  %v3001_v11 = vpop.f32.mrb[19].mxu1  ;;  %v2782_v1 = vld [vmem:[%s3941_s7 + $0x58] sm:$0xff] }
0x11b9   :  { %v3152_v11 = vpack.c.bf16 %v2782_v1, %v2781_v10  ;;  %v2790_v1 = vld [vmem:[#allocation8 + $0xe] ss:$0 sm:$0xff] }
0x11bb   :  { %v1831_v12 = vpop.f32.mrb[20].mxu1 }
0x11bc   :  { %1836 = vrot.lane.b32.xlu0 %v1831_v12, %s3351_s18  ;;  %v3011_v13 = vpop.f32.mrb[21].mxu1  ;;  %v2784_v12 = vld [vmem:[%s3941_s7 + $0x68] sm:$0xff] }
0x11bf   :  { %v2002_v14 = vpop.f32.mrb[22].mxu1 }
0x11c0   :  { %2006 = vst.msk [vmem:[#allocation3 + $0x8] sm:$0xff] %vm344_vm3, %v2002_v14  ;;  %v3021_v15 = vpop.f32.mrb[23].mxu1  ;;  %v2785_v14 = vld [vmem:[%s3941_s7 + $0x70] sm:$0xff] }
0x11c1   :  { %v2786_v15 = vld [vmem:[%s3941_s7 + $0x78] sm:$0xff] }
0x11c2   :  { %v3160_v16 = vpack.c.bf16 %v2786_v15, %v2785_v14 }
0x11f1   :  { %v2170_v22 = vpop.f32.mrb[24].mxu1 }
0x11f2   :  { %2175 = vrot.lane.b32.xlu1 %v2170_v22, %s3351_s18  ;;  %v3031_v23 = vpop.f32.mrb[25].mxu1 }
0x122e   :  { %v1837_v24 = vpop.permute.xlu0 %1836 }
0x122f   :  { %1839 = vst.msk [vmem:[#allocation3] sm:$0xff] %vm685_vm5, %v1837_v24 }
0x1236   :  { %v2179_v25 = vld [vmem:[#allocation3] sm:$0xff] }
0x1237   :  { %3040 = vmatprep.mubr.msk.f32.mxu0 %vm208_vm1, %v2179_v25 }
0x1264   :  { %v2176_v26 = vpop.permute.xlu1 %2175 }
0x1265   :  { %2178 = vst.msk [vmem:[#allocation3 + $0x8] sm:$0xff] %vm685_vm5, %v2176_v26 }
0x126c   :  { %v2180_v36 = vld [vmem:[#allocation3 + $0x8] sm:$0xff] }
0x126d   :  { %3041 = vmatmul.mubr.msk.f32.vlgmr.msra.gmra.mrb[16].mxu0 %vm208_vm1, %v2180_v36 }
0x126e   :  { %3151 = vmatpush3.bf16.msra.mxu0 %v3148_v9 }
0x126f   :  { %3153 = vmatprep.subr.bf16.mxu0 %v3152_v11 }
0x1272   :  { %3155 = vmatpush3.bf16.msra.mxu0 %v3152_v11 }
0x1340   :  { %v3042_v27 = vpop.f32.mrb[16].mxu0 }
0x1341   :  { %v2269_v28 = vadd.f32 %v3042_v27, %v2767_v32  ;;  %v2263_v29 = vpop.f32.mrb[17].mxu0 }
0x1342   :  { %v2264_v30 = vadd.f32 %v2767_v32, %v2263_v29 }
0x1343   :  { %v2273_v31 = vadd.f32 %v2269_v28, %v3770_v4 }
0x1344   :  { %v2272_v52 = vadd.f32 %v2264_v30, %v3768_v3  ;;  %v2772_v3 = vld [vmem:[%s3940_s6 + $0x20] sm:$0xff] }
0x1345   :  { %v2279_v33 = vsel %vm208_vm1, %v2273_v31, 0.0  ;;  %v3140_v59 = vpack.c.bf16 %v2773_v47, %v2772_v3 }
0x1346   :  { %2280 = vadd.xlane.f32.xlu1 %v2279_v33  ;;  %v2276_v34 = vsel %vm208_vm1, %v2272_v52, 0.0 }
0x1347   :  { %2277 = vadd.xlane.f32.xlu0 %v2276_v34  ;;  %3141 = vmatprep.subr.bf16.mxu1 %v3140_v59 }
0x1348   :  { %3143 = vmatpush3.bf16.msra.mxu1 %v3140_v59 }
0x1349   :  { %3145 = vmatprep.subr.bf16.mxu1 %v3144_v50 }
0x134c   :  { %3147 = vmatpush3.bf16.msra.mxu1 %v3144_v50 }
0x13d3   :  { %v2281_v35 = vpop.xlane.xlu1 %2280 }
0x13d4   :  { %v2283_v38 = vmul.f32 0.03125, %v2281_v35  ;;  %v2278_v39 = vpop.xlane.xlu0 %2277 }
0x13d5   :  { %v2282_v40 = vmul.f32 0.03125, %v2278_v39 }
0x13d6   :  { %v2285_v43 = vsub.f32 %v2273_v31, %v2283_v38 }
0x13d7   :  { %v2284_v44 = vsub.f32 %v2272_v52, %v2282_v40  ;;  %v2787_v40 = vld [vmem:[#allocation8 + $0xd] ss:$0 sm:$0xff] }
0x13d8   :  { %v2287_v46 = vmul.f32 %v2285_v43, %v2285_v43 }
0x13d9   :  { %v2286_v41 = vmul.f32 %v2284_v44, %v2284_v44 }
0x13da   :  { %v2291_v4 = vsel %vm208_vm1, %v2287_v46, 0.0 }
0x13db   :  { %v2288_v45 = vsel %vm208_vm1, %v2286_v41, 0.0 }
0x13dc   :  { %2289 = vadd.xlane.f32.xlu0 %v2288_v45 }
0x13e0   :  { %2292 = vadd.xlane.f32.xlu0 %v2291_v4 }
0x1469   :  { %v2290_v51 = vpop.xlane.xlu0 %2289 }
0x146a   :  { %v2294_v53 = vmul.f32 0.03125, %v2290_v51 }
0x146c   :  { %v2296_v54 = vadd.f32 1e-12, %v2294_v53 }
0x146d   :  { %v2293_v42 = vpop.xlane.xlu0 %2292 }
0x146e   :  { %3236 = vrsqrt.f32 %v2296_v54  ;;  %v2295_v55 = vmul.f32 0.03125, %v2293_v42 }
0x1470   :  { %v2297_v56 = vadd.f32 1e-12, %v2295_v55 }
0x1472   :  { %3238 = vrsqrt.f32 %v2297_v56 }
0x1478   :  { %v3237_v57 = vpop.eup %3236 }
0x1479   :  { %v2300_v60 = vmul.f32 %v3237_v57, %v2284_v44  ;;  %v2565_v57 = vld [vmem:[%s3943_s9] sm:$0xff] }
0x147b   :  { %v2306_v62 = vmul.f32 %v2770_v58, %v2300_v60 }
0x147c   :  { %v3239_v63 = vpop.eup %3238 }
0x147d   :  { %v2301_v0 = vmul.f32 %v3239_v63, %v2285_v43  ;;  %v2312_v2 = vadd.f32 %v2771_v61, %v2306_v62  ;;  %v2568_v62 = vld [vmem:[%s3943_s9 + $0x18] sm:$0xff]  ;;  %v3352_v63 = vmov 0.0|0.0  }
0x147e   :  { %3164 = vmatprep.subr.bf16.mxu1 %v3352_v63 }
0x147f   :  { %v2307_v5 = vmul.f32 %v2770_v58, %v2301_v0  ;;  %3051 = vmatprep.mubr.msk.f32.mxu1 %vm208_vm1, %v2312_v2  ;;  %v2566_v58 = vld [vmem:[%s3943_s9 + $0x8] sm:$0xff] }
0x1480   :  { %v3165_v60 = vpack.c.bf16 %v2566_v58, %v2565_v57 }
0x1481   :  { %v2313_v6 = vadd.f32 %v2771_v61, %v2307_v5  ;;  %v2567_v61 = vld [vmem:[%s3943_s9 + $0x10] sm:$0xff] }
0x1482   :  { %v3168_v0 = vpack.c.bf16 %v2568_v62, %v2567_v61 }
0x1483   :  { %3052 = vmatmul.mubr.msk.f32.vlgmr.msra.gmra.mrb[26].mxu1 %vm208_vm1, %v2313_v6 }
0x1484   :  { %3081 = vmatprep.mubr.msk.f32.mxu1 %vm3345_vm2, %v3344_v37  ;;  %v2783_v37 = vld [vmem:[%s3941_s7 + $0x60] sm:$0xff]  ;;  %3166 = vmatpush3.bf16.msra.mxu1 %v3165_v60 }
0x1485   :  { %v3156_v13 = vpack.c.bf16 %v2784_v12, %v2783_v37  ;;  %3167 = vmatprep.subr.bf16.mxu1 %v3352_v63 }
0x1487   :  { %3157 = vmatprep.subr.bf16.mxu0 %v3156_v13 }
0x1488   :  { %3159 = vmatpush3.bf16.msra.mxu0 %v3156_v13  ;;  %3169 = vmatpush3.bf16.msra.mxu1 %v3168_v0  ;;  %v2791_v13 = vld [vmem:[#allocation8 + $0xf] ss:$0 sm:$0xff] }
0x1489   :  { %3161 = vmatprep.subr.bf16.mxu0 %v3160_v16 }
0x148c   :  { %3163 = vmatpush3.bf16.msra.mxu0 %v3160_v16 }
0x1556   :  { %v3053_v18 = vpop.f32.mrb[26].mxu1 }
0x1557   :  { %v2402_v19 = vadd.f32 %v3053_v18, %v2776_v17  ;;  %v2396_v20 = vpop.f32.mrb[27].mxu1 }
0x1558   :  { %v2397_v21 = vadd.f32 %v2776_v17, %v2396_v20  ;;  %v2792_v20 = vld [vmem:[#allocation10 + $0x3] ss:$0 sm:$0xff] }
0x1559   :  { %v2408_v22 = vmul.f32 0.044715, %v2402_v19  ;;  %v2406_v35 = vmul.f32 0.5, %v2402_v19 }
0x155a   :  { %v2407_v23 = vmul.f32 0.044715, %v2397_v21  ;;  %v2405_v33 = vmul.f32 0.5, %v2397_v21 }
0x155b   :  { %v2410_v24 = vmul.f32 %v2408_v22, %v2402_v19 }
0x155c   :  { %v2409_v25 = vmul.f32 %v2407_v23, %v2397_v21 }
0x155d   :  { %v2412_v26 = vmul.f32 %v2410_v24, %v2402_v19  ;;  %v2794_v24 = vld [vmem:[#allocation10 + $0x4] ss:$0 sm:$0xff] }
0x155e   :  { %v2411_v36 = vmul.f32 %v2409_v25, %v2397_v21 }
0x155f   :  { %v2414_v32 = vadd.f32 %v2412_v26, %v2402_v19 }
0x1560   :  { %v2413_v27 = vadd.f32 %v2411_v36, %v2397_v21 }
0x1561   :  { %v2416_v28 = vmul.f32 0.7978846, %v2414_v32  ;;  %v3353_v32 = vmov 0  }
0x1562   :  { %v2415_v29 = vmul.f32 0.7978846, %v2413_v27  ;;  %3186 = vset.pattern.permute.xlu1 %v3353_v32  ;;  %3187 = vset.pattern.permute.xlu0 %v3353_v32  ;;  %v2795_v27 = vld [vmem:[#allocation10 + $0x5] ss:$0 sm:$0xff] }
0x1563   :  { %3240 = vtanh.f32 %v2416_v28 }
0x1564   :  { %3242 = vtanh.f32 %v2415_v29 }
0x156d   :  { %v3241_v30 = vpop.eup %3240 }
0x156e   :  { %v3243_v31 = vpop.eup %3242  ;;  %v2420_v52 = vadd.f32 1.0, %v3241_v30 }
0x156f   :  { %v2419_v34 = vadd.f32 1.0, %v3243_v31 }
0x1570   :  { %v2422_v39 = vmul.f32 %v2420_v52, %v2406_v35 }
0x1571   :  { %v2421_v38 = vmul.f32 %v2419_v34, %v2405_v33 }
0x1573   :  { %3070 = vmatprep.mubr.msk.f32.mxu0 %vm1285_vm6, %v2421_v38 }
0x1574   :  { %3071 = vmatmul.mubr.msk.f32.vlgmr.msra.gmra.mrb[18].mxu0 %vm1285_vm6, %v2422_v39 }
0x1647   :  { %v3072_v43 = vpop.f32.mrb[18].mxu0 }
0x1648   :  { %v2515_v44 = vadd.f32 %v3072_v43, %v2787_v40  ;;  %v2509_v41 = vpop.f32.mrb[19].mxu0 }
0x1649   :  { %v2510_v45 = vadd.f32 %v2787_v40, %v2509_v41 }
0x164a   :  { %v2519_v46 = vadd.f32 %v2515_v44, %v2313_v6 }
0x164b   :  { %v2518_v4 = vadd.f32 %v2510_v45, %v2312_v2 }
0x164c   :  { %v2525_v3 = vsel %vm208_vm1, %v2519_v46, 0.0 }
0x164d   :  { %2526 = vadd.xlane.f32.xlu0 %v2525_v3  ;;  %v2522_v47 = vsel %vm208_vm1, %v2518_v4, 0.0 }
0x164e   :  { %2523 = vadd.xlane.f32.xlu1 %v2522_v47 }
0x16da   :  { %v2527_v59 = vpop.xlane.xlu0 %2526 }
0x16db   :  { %v2529_v48 = vmul.f32 0.03125, %v2527_v59  ;;  %v2524_v49 = vpop.xlane.xlu1 %2523 }
0x16dc   :  { %v2528_v50 = vmul.f32 0.03125, %v2524_v49 }
0x16dd   :  { %v2531_v51 = vsub.f32 %v2519_v46, %v2529_v48 }
0x16de   :  { %v2530_v53 = vsub.f32 %v2518_v4, %v2528_v50 }
0x16df   :  { %v2533_v54 = vmul.f32 %v2531_v51, %v2531_v51 }
0x16e0   :  { %v2532_v42 = vmul.f32 %v2530_v53, %v2530_v53 }
0x16e1   :  { %v2537_v55 = vsel %vm208_vm1, %v2533_v54, 0.0 }
0x16e2   :  { %2538 = vadd.xlane.f32.xlu0 %v2537_v55  ;;  %v2534_v56 = vsel %vm208_vm1, %v2532_v42, 0.0 }
0x16e3   :  { %2535 = vadd.xlane.f32.xlu1 %v2534_v56 }
0x176f   :  { %v2539_v2 = vpop.xlane.xlu0 %2538 }
0x1770   :  { %v2541_v5 = vmul.f32 0.03125, %v2539_v2  ;;  %v2536_v6 = vpop.xlane.xlu1 %2535 }
0x1771   :  { %v2540_v7 = vmul.f32 0.03125, %v2536_v6 }
0x1772   :  { %v2543_v8 = vadd.f32 1e-12, %v2541_v5 }
0x1773   :  { %v2542_v9 = vadd.f32 1e-12, %v2540_v7 }
0x1774   :  { %3244 = vrsqrt.f32 %v2543_v8 }
0x1775   :  { %3246 = vrsqrt.f32 %v2542_v9 }
0x177e   :  { %v3245_v10 = vpop.eup %3244 }
0x177f   :  { %v3247_v11 = vpop.eup %3246  ;;  %v2547_v37 = vmul.f32 %v3245_v10, %v2531_v51 }
0x1780   :  { %v2546_v12 = vmul.f32 %v3247_v11, %v2530_v53 }
0x1781   :  { %v2553_v14 = vmul.f32 %v2790_v1, %v2547_v37 }
0x1782   :  { %v2552_v15 = vmul.f32 %v2790_v1, %v2546_v12 }
0x1783   :  { %v2559_v16 = vadd.f32 %v2791_v13, %v2553_v14 }
0x1784   :  { %v2558_v17 = vadd.f32 %v2791_v13, %v2552_v15 }
0x1785   :  { %v2561_v18 = vrot.slane %v2559_v16, 7 }
0x1787   :  { %v2564_v19 = vsel %vm2563_vm7, %v2558_v17, %v2561_v18 }
0x1788   :  { %3082 = vmatmul.mubr.msk.f32.vlgmr.msra.gmra.mrb[28].mxu1 %vm208_vm1, %v2564_v19 }
0x185b   :  { %v2643_v21 = vpop.f32.mrb[28].mxu1 }
0x185c   :  { %v2644_v22 = vadd.f32 %v2792_v20, %v2643_v21  ;;  %v3083_v23 = vpop.f32.mrb[29].mxu1 }
0x185e   :  { %3248 = vtanh.f32 %v2644_v22 }
0x1868   :  { %v3249_v25 = vpop.eup %3248 }
0x1869   :  { %v2653_v26 = vmul.f32 %v3249_v25, %v2794_v24 }
0x186b   :  { %v2655_v36 = vsel %vm2654_vm8, %v2653_v26, 0.0 }
0x186c   :  { %2656 = vadd.xlane.f32.xlu0 %v2655_v36 }
0x18f9   :  { %v2657_v28 = vpop.xlane.xlu0 %2656 }
0x18fa   :  { %v2663_v29 = vadd.f32 %v2795_v27, %v2657_v28 }
0x18fc   :  { %v2664_v30 = vsub.f32 0.0, %v2663_v29 }
0x18fe   :  { %v2665_v31 = vmul.f32 1.442695, %v2664_v30 }
0x1900   :  { %3250 = vpow2.f32 %v2665_v31 }
0x190a   :  { %v3251_v52 = vpop.eup %3250 }
0x190b   :  { %v2667_v33 = vadd.f32 1.0, %v3251_v52 }
0x190d   :  { %3252 = vrcp.f32 %v2667_v33 }
0x1917   :  { %v3253_v34 = vpop.eup %3252 }
0x1918   :  { %2672 = vperm.xlu1 %3186, %v3253_v34  }
0x1997   :  { %v2673_v35 = vpop.permute.xlu1 %2672 }
0x1998   :  { %2675 = vst [vmem:[%s3945_s11] sm:$0x3] %v2673_v35 }
0x1999   :  { %2680 = vsyncpa [#allocation5], 1 }
0x199a   :  { %2681 = vsyncpa [#allocation9], 1 }
0x199b   :  { %2682 = vsyncpa [#allocation6], 1 }

</bundles_post_ra>
